<compile_context>
chip_gen: v5e
topology: v5e:2x2
jax: 0.10.0
libtpu: 0.0.40
codegen_flags: <defaults>
</compile_context>

<pallas_src>
import jax
import jax.numpy as jnp
from jax.experimental import pallas as pl
from jax.experimental.pallas import tpu as pltpu


class Config:
    vocab_size = 128
    emb_dim = 32
    hidden_dim = 32
    pointer_gen = True
    is_coverage = True
    trunc_norm_init_std = 1e-2
    rand_unif_init_mag = 0.02


config = Config()


# ----------------------------------------------------------------------------
# Pallas kernel: one full decoder step.
# ----------------------------------------------------------------------------
def decoder_step_kernel(
    # data
    y_ref, h_ref, c_ref, enc_out_ref, enc_feat_ref, mask_ref, c_t1_ref,
    ext_ids_ref, cov_ref,
    # params
    emb_ref, xctx_w_c_ref, xctx_w_e_ref, xctx_b_ref,
    wx_ref, w_hh_ref, b_lstm_ref,
    wh_ref, wc_ref, dproj_b_ref, wcov_ref, v_ref,
    wct_ref, pgen_b_ref, out1_b_ref, out2_w_ref, out2_b_ref,
    # outputs
    final_ref, slab_ref,
):
    f32 = jnp.float32
    B, H = h_ref.shape
    _, T, H2 = enc_out_ref.shape
    V, E = emb_ref.shape
    V_ext = final_ref.shape[1]
    slab_w = slab_ref.shape[1]

    # --- embedding lookup via one-hot matmul (MXU) ---
    y_ids = y_ref[...]                                            # (B, 1) int32
    vocab_iota = jax.lax.broadcasted_iota(jnp.int32, (B, V), 1)
    y_onehot = (vocab_iota == y_ids).astype(f32)                  # (B, V)
    y_embd = jnp.dot(y_onehot, emb_ref[...], preferred_element_type=f32)   # (B, E)

    # --- x = x_context(cat(c_t_1, y_embd))  (concat folded into split matmuls) ---
    x = (jnp.dot(c_t1_ref[...], xctx_w_c_ref[...], preferred_element_type=f32)
         + jnp.dot(y_embd, xctx_w_e_ref[...], preferred_element_type=f32)
         + xctx_b_ref[...])                                       # (B, E)

    # --- LSTM gates + p_gen(x) contribution in ONE fused matmul: x @ [W_ih | W_pgen_x] ---
    xg = jnp.dot(x, wx_ref[...], preferred_element_type=f32)      # (B, 4H+1)
    gates = (xg[:, :4 * H]
             + jnp.dot(h_ref[...], w_hh_ref[...], preferred_element_type=f32)
             + b_lstm_ref[...])                                   # (B, 4H)
    pgen_x = xg[:, 4 * H:4 * H + 1]                               # (B, 1)

    # PyTorch gate order (i, f, g, o)
    i_g = jax.nn.sigmoid(gates[:, 0:H])
    f_g = jax.nn.sigmoid(gates[:, H:2 * H])
    g_g = jnp.tanh(gates[:, 2 * H:3 * H])
    o_g = jax.nn.sigmoid(gates[:, 3 * H:4 * H])
    c_new = f_g * c_ref[...] + i_g * g_g
    h_new = o_g * jnp.tanh(c_new)                                 # (B, H) == lstm_out

    # --- fused projections of h_new / c_new (decode_proj + out1_h + pgen_h/c) ---
    hm = jnp.dot(h_new, wh_ref[...], preferred_element_type=f32)  # (B, 3H+1)
    cm = jnp.dot(c_new, wc_ref[...], preferred_element_type=f32)  # (B, 2H+1)
    dec_fea = hm[:, :2 * H] + cm[:, :2 * H] + dproj_b_ref[...]    # (B, 2H)
    out1_h = hm[:, 2 * H:3 * H]                                   # (B, H)
    pgen_h = hm[:, 3 * H:3 * H + 1]                               # (B, 1)
    pgen_c = cm[:, 2 * H:2 * H + 1]                               # (B, 1)

    # --- attention with coverage; mask fused into a single softmax normalization ---
    wcov_b = wcov_ref[...][None, :, :]                            # (1, 1, 2H)
    v_b = v_ref[...][None, :, :]                                  # (1, 1, 2H)
    cov = cov_ref[...]                                            # (B, T)
    att = enc_feat_ref[...] + dec_fea[:, None, :] + cov[:, :, None] * wcov_b
    e = jnp.tanh(att)                                             # (B, T, 2H)
    # TODO(synk): at large T, move this reduction onto the MXU as well.
    scores = jnp.sum(e * v_b, axis=-1)                            # (B, T)
    m = jnp.max(scores, axis=1, keepdims=True)
    pexp = jnp.exp(scores - m) * mask_ref[...]
    attn_dist = pexp * pl.reciprocal(jnp.sum(pexp, axis=1, keepdims=True),
                                     approx=False)                # (B, T)
    coverage_next = cov + attn_dist

    # --- context vector via batched MXU matmul: (B,1,T) @ (B,T,2H) ---
    c_t = jnp.einsum('bst,btk->bsk', attn_dist[:, None, :], enc_out_ref[...],
                     preferred_element_type=f32).reshape(B, H2)   # (B, 2H)

    # --- fused c_t projection (out1_ct + pgen_ct), then p_gen and vocab logits ---
    ctm = jnp.dot(c_t, wct_ref[...], preferred_element_type=f32)  # (B, H+1)
    out1_ct = ctm[:, :H]
    pgen_ct = ctm[:, H:H + 1]
    p_gen = jax.nn.sigmoid(pgen_x + pgen_h + pgen_c + pgen_ct + pgen_b_ref[...])  # (B, 1)

    hid = out1_h + out1_ct + out1_b_ref[...]                      # (B, H)
    # out2 was extended in the wrapper to V_ext columns (zero weight, -inf bias
    # for the extra slots), so the softmax over V_ext equals softmax over V with
    # exact zeros in the extension -> final_dist in one dense store.
    logits = (jnp.dot(hid, out2_w_ref[...], preferred_element_type=f32)
              + out2_b_ref[...])                                  # (B, V_ext)
    lm = jnp.max(logits, axis=1, keepdims=True)
    le = jnp.exp(logits - lm)
    vocab_dist = le * pl.reciprocal(jnp.sum(le, axis=1, keepdims=True),
                                    approx=False)                 # (B, V_ext)

    vocab_dist_ = p_gen * vocab_dist                              # (B, V_ext)
    attn_w = (1.0 - p_gen) * attn_dist                            # (B, T)

    # --- scatter_add into extended vocab via select-and-reduce ---
    # TODO(synk): vocab-tile this block for realistic V (mandatory on v7x VMEM).
    ids = ext_ids_ref[...]                                        # (B, T) int32
    vext_iota = jax.lax.broadcasted_iota(jnp.int32, (B, T, V_ext), 2)
    added = jnp.sum(jnp.where(vext_iota == ids[:, :, None],
                              attn_w[:, :, None], 0.0), axis=1)   # (B, V_ext)

    # single lane-dense full-row store of the final distribution
    final_ref[...] = vocab_dist_ + added

    # pack all narrow per-step outputs into one lane-dense slab
    slab_ref[:, 0:H] = h_new
    slab_ref[:, H:2 * H] = c_new
    slab_ref[:, 2 * H:4 * H] = c_t
    slab_ref[:, 4 * H:4 * H + 1] = p_gen
    slab_ref[:, 4 * H + 1:4 * H + 1 + T] = attn_dist
    slab_ref[:, 4 * H + 1 + T:4 * H + 1 + 2 * T] = coverage_next
    packed_w = 4 * H + 1 + 2 * T
    if slab_w > packed_w:  # static
        slab_ref[:, packed_w:] = jnp.zeros((B, slab_w - packed_w), f32)


# ----------------------------------------------------------------------------
# Wrapper (glue: reshapes / weight merging / pallas_call / output unpacking)
# ----------------------------------------------------------------------------
def decoder_step(y_t_1, s_t_1, encoder_outputs, encoder_feature, enc_padding_mask,
                 c_t_1, extra_zeros, enc_batch_extend_vocab, coverage, params):
    H = config.hidden_dim
    V = config.vocab_size
    B, T, H2 = encoder_outputs.shape
    NE = extra_zeros.shape[1]
    f32 = jnp.float32

    h_prev = s_t_1[0].reshape(B, H)
    c_prev = s_t_1[1].reshape(B, H)
    enc_feat = encoder_feature.reshape(B, T, H2)
    y_ids = y_t_1.reshape(B, 1).astype(jnp.int32)

    p = params
    # Merge matmuls that share the same LHS (pgen / decode_proj / out1 columns).
    wmh = jnp.concatenate([p['dproj_wT'][:H], p['out1_wT'][:H],
                           p['pgen_wT'][2 * H:3 * H]], axis=1)        # (H, 3H+1)
    wmc = jnp.concatenate([p['dproj_wT'][H:], p['pgen_wT'][3 * H:4 * H]], axis=1)  # (H, 2H+1)
    wmct = jnp.concatenate([p['out1_wT'][H:], p['pgen_wT'][:2 * H]], axis=1)       # (2H, H+1)
    wmx = jnp.concatenate([p['w_ih_T'], p['pgen_wT'][4 * H:]], axis=1)             # (E, 4H+1)
    # Extend out2 over the extended vocab: zero weights, -inf bias -> exact zeros
    # in the extension; lets the kernel emit final_dist with one dense store.
    out2_w_ext = jnp.concatenate([p['out2_wT'], jnp.zeros((H, NE), f32)], axis=1)
    out2_b_ext = jnp.concatenate([p['out2_b'], jnp.full((1, NE), -1e30, f32)], axis=1)

    packed_w = 4 * H + 1 + 2 * T
    slab_w = ((packed_w + 127) // 128) * 128

    args = (
        y_ids, h_prev, c_prev, encoder_outputs, enc_feat,
        enc_padding_mask.astype(f32), c_t_1,
        enc_batch_extend_vocab.astype(jnp.int32), coverage,
        p['embedding'],
        p['xctx_wT'][:2 * H], p['xctx_wT'][2 * H:], p['xctx_b'],
        wmx, p['w_hh_T'], p['b_lstm'],
        wmh, wmc, p['dproj_b'], p['w_c'], p['v_w'],
        wmct, p['pgen_b'], p['out1_b'], out2_w_ext, out2_b_ext,
    )

    out_shapes = (
        jax.ShapeDtypeStruct((B, V + NE), f32),    # final_dist (lane-dense)
        jax.ShapeDtypeStruct((B, slab_w), f32),    # packed: h|c|c_t|p_gen|attn|cov|pad
    )
    vmem = pl.BlockSpec(memory_space=pltpu.MemorySpace.VMEM)
    final_dist, slab = pl.pallas_call(
        decoder_step_kernel,
        out_shape=out_shapes,
        in_specs=[vmem] * len(args),
        out_specs=(vmem, vmem),
        compiler_params=pltpu.CompilerParams(vmem_limit_bytes=32 * 1024 * 1024),
    )(*args)

    h_t = slab[:, 0:H]
    c_dec_t = slab[:, H:2 * H]
    c_t = slab[:, 2 * H:4 * H]
    p_gen = slab[:, 4 * H:4 * H + 1]
    attn_dist = slab[:, 4 * H + 1:4 * H + 1 + T]
    coverage_next = slab[:, 4 * H + 1 + T:4 * H + 1 + 2 * T]

    s_t = (h_t.reshape(1, B, H), c_dec_t.reshape(1, B, H))
    return final_dist, s_t, c_t, attn_dist, p_gen, coverage_next


# ----------------------------------------------------------------------------
# Deterministic parameter init (mirrors the nn.Module __init__ shapes)
# ----------------------------------------------------------------------------
def init_params(key):
    H, E, V = config.hidden_dim, config.emb_dim, config.vocab_size
    ks = jax.random.split(key, 16)

    def nrm(k, shape, std=0.1):
        return (std * jax.random.normal(k, shape)).astype(jnp.float32)

    u = config.rand_unif_init_mag
    p = {}
    p['embedding'] = nrm(ks[0], (V, E), config.trunc_norm_init_std)
    p['xctx_wT'] = nrm(ks[1], (2 * H + E, E))                      # x_context
    p['xctx_b'] = nrm(ks[2], (1, E))
    p['w_ih_T'] = jax.random.uniform(ks[3], (E, 4 * H), jnp.float32, -u, u)
    p['w_hh_T'] = jax.random.uniform(ks[4], (H, 4 * H), jnp.float32, -u, u)
    b = jnp.zeros((4 * H,), jnp.float32).at[H:2 * H].set(1.0)      # forget bias = 1
    p['b_lstm'] = (b + b).reshape(1, 4 * H)                        # b_ih + b_hh
    p['dproj_wT'] = nrm(ks[5], (2 * H, 2 * H))                     # Attention.decode_proj
    p['dproj_b'] = nrm(ks[6], (1, 2 * H))
    p['w_c'] = nrm(ks[7], (1, 2 * H))                              # Attention.W_c (1->2H)
    p['v_w'] = nrm(ks[8], (1, 2 * H))                              # Attention.v (2H->1)
    p['pgen_wT'] = nrm(ks[9], (4 * H + E, 1))                      # p_gen_linear
    p['pgen_b'] = nrm(ks[10], (1, 1))
    p['out1_wT'] = nrm(ks[11], (3 * H, H))
    p['out1_b'] = nrm(ks[12], (1, H))
    p['out2_wT'] = nrm(ks[13], (H, V), config.trunc_norm_init_std)
    p['out2_b'] = nrm(ks[14], (1, V), config.trunc_norm_init_std)
    return p


# ----------------------------------------------------------------------------
# Pure-JAX reference (for correctness check only)
# ----------------------------------------------------------------------------
def reference_step(y_t_1, s_t_1, encoder_outputs, encoder_feature, enc_padding_mask,
                   c_t_1, extra_zeros, enc_batch_extend_vocab, coverage, p):
    H, V = config.hidden_dim, config.vocab_size
    B, T, H2 = encoder_outputs.shape
    h_prev = s_t_1[0].reshape(B, H)
    c_prev = s_t_1[1].reshape(B, H)
    y_embd = p['embedding'][y_t_1]
    x = jnp.concatenate([c_t_1, y_embd], 1) @ p['xctx_wT'] + p['xctx_b']
    gates = x @ p['w_ih_T'] + h_prev @ p['w_hh_T'] + p['b_lstm']
    i_g = jax.nn.sigmoid(gates[:, :H]); f_g = jax.nn.sigmoid(gates[:, H:2 * H])
    g_g = jnp.tanh(gates[:, 2 * H:3 * H]); o_g = jax.nn.sigmoid(gates[:, 3 * H:])
    c_new = f_g * c_prev + i_g * g_g
    h_new = o_g * jnp.tanh(c_new)
    s_t_hat = jnp.concatenate([h_new, c_new], 1)
    dec_fea = s_t_hat @ p['dproj_wT'] + p['dproj_b']
    att = encoder_feature.reshape(B, T, H2) + dec_fea[:, None, :]
    att = att + coverage[:, :, None] * p['w_c'].reshape(1, 1, H2)
    e = jnp.tanh(att)
    scores = jnp.sum(e * p['v_w'].reshape(1, 1, H2), -1)
    attn_ = jax.nn.softmax(scores, axis=1) * enc_padding_mask
    attn = attn_ / jnp.sum(attn_, 1, keepdims=True)
    c_t = jnp.einsum('bt,btn->bn', attn, encoder_outputs)
    cov_next = coverage + attn
    p_gen = jax.nn.sigmoid(jnp.concatenate([c_t, s_t_hat, x], 1) @ p['pgen_wT'] + p['pgen_b'])
    out = jnp.concatenate([h_new, c_t], 1) @ p['out1_wT'] + p['out1_b']
    logits = out @ p['out2_wT'] + p['out2_b']
    vocab_dist = jax.nn.softmax(logits, axis=1)
    vd = p_gen * vocab_dist
    aw = (1.0 - p_gen) * attn
    vd_ext = jnp.concatenate([vd, extra_zeros], 1)
    final = jax.vmap(lambda v_, i_, a_: v_.at[i_].add(a_))(vd_ext, enc_batch_extend_vocab, aw)
    return (final, (h_new.reshape(1, B, H), c_new.reshape(1, B, H)),
            c_t, attn, p_gen, cov_next)


if __name__ == "__main__":
    B, T, NE = 2, 8, 8
    H, V = config.hidden_dim, config.vocab_size

    key = jax.random.PRNGKey(0)
    ks = jax.random.split(key, 10)
    params = init_params(ks[0])

    y_t_1 = jax.random.randint(ks[1], (B,), 0, V)
    s_t_1 = (0.1 * jax.random.normal(ks[2], (1, B, H), jnp.float32),
             0.1 * jax.random.normal(ks[3], (1, B, H), jnp.float32))
    encoder_outputs = 0.1 * jax.random.normal(ks[4], (B, T, 2 * H), jnp.float32)
    encoder_feature = 0.1 * jax.random.normal(ks[5], (B * T, 2 * H), jnp.float32)
    enc_padding_mask = jnp.array([[1, 1, 1, 1, 1, 1, 0, 0],
                                  [1, 1, 1, 1, 1, 0, 0, 0]], jnp.float32)
    c_t_1 = 0.1 * jax.random.normal(ks[6], (B, 2 * H), jnp.float32)
    extra_zeros = jnp.zeros((B, NE), jnp.float32)
    enc_batch_extend_vocab = jax.random.randint(ks[7], (B, T), 0, V + NE)
    coverage = jnp.zeros((B, T), jnp.float32)

    outs = decoder_step(y_t_1, s_t_1, encoder_outputs, encoder_feature,
                        enc_padding_mask, c_t_1, extra_zeros,
                        enc_batch_extend_vocab, coverage, params)
    jax.block_until_ready(outs)

    ref = reference_step(y_t_1, s_t_1, encoder_outputs, encoder_feature,
                         enc_padding_mask, c_t_1, extra_zeros,
                         enc_batch_extend_vocab, coverage, params)

    for a, b in zip(jax.tree_util.tree_leaves(outs), jax.tree_util.tree_leaves(ref)):
        assert a.shape == b.shape, (a.shape, b.shape)
        assert jnp.allclose(a, b, rtol=1e-4, atol=1e-5), float(jnp.max(jnp.abs(a - b)))

    # final_dist rows must sum to 1 (p_gen*vocab + (1-p_gen)*attn)
    assert jnp.allclose(jnp.sum(outs[0], axis=1), 1.0, atol=1e-5)

    print("KERNEL_OK")
</pallas_src>

<mosaic_0001>
module attributes {stable_mosaic.version = 11 : i64} {
  func.func @decoder_step_kernel(%arg0: memref<2x1xi32, #tpu.memory_space<vmem>>, %arg1: memref<2x32xf32, #tpu.memory_space<vmem>>, %arg2: memref<2x32xf32, #tpu.memory_space<vmem>>, %arg3: memref<2x8x64xf32, #tpu.memory_space<vmem>>, %arg4: memref<2x8x64xf32, #tpu.memory_space<vmem>>, %arg5: memref<2x8xf32, #tpu.memory_space<vmem>>, %arg6: memref<2x64xf32, #tpu.memory_space<vmem>>, %arg7: memref<2x8xi32, #tpu.memory_space<vmem>>, %arg8: memref<2x8xf32, #tpu.memory_space<vmem>>, %arg9: memref<128x32xf32, #tpu.memory_space<vmem>>, %arg10: memref<64x32xf32, #tpu.memory_space<vmem>>, %arg11: memref<32x32xf32, #tpu.memory_space<vmem>>, %arg12: memref<1x32xf32, #tpu.memory_space<vmem>>, %arg13: memref<32x129xf32, #tpu.memory_space<vmem>>, %arg14: memref<32x128xf32, #tpu.memory_space<vmem>>, %arg15: memref<1x128xf32, #tpu.memory_space<vmem>>, %arg16: memref<32x97xf32, #tpu.memory_space<vmem>>, %arg17: memref<32x65xf32, #tpu.memory_space<vmem>>, %arg18: memref<1x64xf32, #tpu.memory_space<vmem>>, %arg19: memref<1x64xf32, #tpu.memory_space<vmem>>, %arg20: memref<1x64xf32, #tpu.memory_space<vmem>>, %arg21: memref<64x33xf32, #tpu.memory_space<vmem>>, %arg22: memref<1x1xf32, #tpu.memory_space<vmem>>, %arg23: memref<1x32xf32, #tpu.memory_space<vmem>>, %arg24: memref<32x136xf32, #tpu.memory_space<vmem>>, %arg25: memref<1x136xf32, #tpu.memory_space<vmem>>, %arg26: memref<2x136xf32, #tpu.memory_space<vmem>>, %arg27: memref<2x256xf32, #tpu.memory_space<vmem>>) attributes {dimension_semantics = [], scalar_prefetch = 0 : i64, scratch_operands = 0 : i64, tpu.core_type = #tpu.core_type<tc>} {
    %c0 = arith.constant 0 : index
    %c0_0 = arith.constant 0 : index
    %0 = vector.load %arg0[%c0, %c0_0] : memref<2x1xi32, #tpu.memory_space<vmem>>, vector<2x1xi32>
    %1 = tpu.iota {dimensions = array<i32: 1>} : vector<2x128xi32>
    %2 = vector.broadcast %0 : vector<2x1xi32> to vector<2x128xi32>
    %3 = arith.cmpi eq, %1, %2 : vector<2x128xi32>
    %4 = arith.extui %3 : vector<2x128xi1> to vector<2x128xi32>
    %5 = arith.sitofp %4 : vector<2x128xi32> to vector<2x128xf32>
    %c0_1 = arith.constant 0 : index
    %c0_2 = arith.constant 0 : index
    %6 = vector.load %arg9[%c0_1, %c0_2] : memref<128x32xf32, #tpu.memory_space<vmem>>, vector<128x32xf32>
    %cst = arith.constant dense<0.000000e+00> : vector<2x32xf32>
    %7 = tpu.matmul %5, %6, %cst {dimension_numbers = #tpu.dot_dimension_numbers<[1], [0], [0], [1], [0, 0, 1, 1], [], []>} : vector<2x128xf32>, vector<128x32xf32>, vector<2x32xf32> -> vector<2x32xf32>
    %c0_3 = arith.constant 0 : index
    %c0_4 = arith.constant 0 : index
    %8 = vector.load %arg6[%c0_3, %c0_4] : memref<2x64xf32, #tpu.memory_space<vmem>>, vector<2x64xf32>
    %c0_5 = arith.constant 0 : index
    %c0_6 = arith.constant 0 : index
    %9 = vector.load %arg10[%c0_5, %c0_6] : memref<64x32xf32, #tpu.memory_space<vmem>>, vector<64x32xf32>
    %cst_7 = arith.constant dense<0.000000e+00> : vector<2x32xf32>
    %10 = tpu.matmul %8, %9, %cst_7 {dimension_numbers = #tpu.dot_dimension_numbers<[1], [0], [0], [1], [0, 0, 1, 1], [], []>} : vector<2x64xf32>, vector<64x32xf32>, vector<2x32xf32> -> vector<2x32xf32>
    %c0_8 = arith.constant 0 : index
    %c0_9 = arith.constant 0 : index
    %11 = vector.load %arg11[%c0_8, %c0_9] : memref<32x32xf32, #tpu.memory_space<vmem>>, vector<32x32xf32>
    %cst_10 = arith.constant dense<0.000000e+00> : vector<2x32xf32>
    %12 = tpu.matmul %7, %11, %cst_10 {dimension_numbers = #tpu.dot_dimension_numbers<[1], [0], [0], [1], [0, 0, 1, 1], [], []>} : vector<2x32xf32>, vector<32x32xf32>, vector<2x32xf32> -> vector<2x32xf32>
    %13 = arith.addf %10, %12 : vector<2x32xf32>
    %c0_11 = arith.constant 0 : index
    %c0_12 = arith.constant 0 : index
    %14 = vector.load %arg12[%c0_11, %c0_12] : memref<1x32xf32, #tpu.memory_space<vmem>>, vector<1x32xf32>
    %15 = vector.broadcast %14 : vector<1x32xf32> to vector<2x32xf32>
    %16 = arith.addf %13, %15 : vector<2x32xf32>
    %c0_13 = arith.constant 0 : index
    %c0_14 = arith.constant 0 : index
    %17 = vector.load %arg13[%c0_13, %c0_14] : memref<32x129xf32, #tpu.memory_space<vmem>>, vector<32x129xf32>
    %cst_15 = arith.constant dense<0.000000e+00> : vector<2x129xf32>
    %18 = tpu.matmul %16, %17, %cst_15 {dimension_numbers = #tpu.dot_dimension_numbers<[1], [0], [0], [1], [0, 0, 1, 1], [], []>} : vector<2x32xf32>, vector<32x129xf32>, vector<2x129xf32> -> vector<2x129xf32>
    %19 = vector.extract_strided_slice %18 {offsets = [0, 0], sizes = [2, 128], strides = [1, 1]} : vector<2x129xf32> to vector<2x128xf32>
    %c0_16 = arith.constant 0 : index
    %c0_17 = arith.constant 0 : index
    %20 = vector.load %arg1[%c0_16, %c0_17] : memref<2x32xf32, #tpu.memory_space<vmem>>, vector<2x32xf32>
    %c0_18 = arith.constant 0 : index
    %c0_19 = arith.constant 0 : index
    %21 = vector.load %arg14[%c0_18, %c0_19] : memref<32x128xf32, #tpu.memory_space<vmem>>, vector<32x128xf32>
    %cst_20 = arith.constant dense<0.000000e+00> : vector<2x128xf32>
    %22 = tpu.matmul %20, %21, %cst_20 {dimension_numbers = #tpu.dot_dimension_numbers<[1], [0], [0], [1], [0, 0, 1, 1], [], []>} : vector<2x32xf32>, vector<32x128xf32>, vector<2x128xf32> -> vector<2x128xf32>
    %23 = arith.addf %19, %22 : vector<2x128xf32>
    %c0_21 = arith.constant 0 : index
    %c0_22 = arith.constant 0 : index
    %24 = vector.load %arg15[%c0_21, %c0_22] : memref<1x128xf32, #tpu.memory_space<vmem>>, vector<1x128xf32>
    %25 = vector.broadcast %24 : vector<1x128xf32> to vector<2x128xf32>
    %26 = arith.addf %23, %25 : vector<2x128xf32>
    %27 = vector.extract_strided_slice %18 {offsets = [0, 128], sizes = [2, 1], strides = [1, 1]} : vector<2x129xf32> to vector<2x1xf32>
    %28 = vector.extract_strided_slice %26 {offsets = [0, 0], sizes = [2, 32], strides = [1, 1]} : vector<2x128xf32> to vector<2x32xf32>
    %29 = arith.negf %28 : vector<2x32xf32>
    %30 = math.exp %29 : vector<2x32xf32>
    %cst_23 = arith.constant 1.000000e+00 : f32
    %31 = vector.broadcast %cst_23 : f32 to vector<2x32xf32>
    %32 = arith.addf %31, %30 : vector<2x32xf32>
    %33 = arith.divf %31, %32 : vector<2x32xf32>
    %34 = vector.extract_strided_slice %26 {offsets = [0, 32], sizes = [2, 32], strides = [1, 1]} : vector<2x128xf32> to vector<2x32xf32>
    %35 = arith.negf %34 : vector<2x32xf32>
    %36 = math.exp %35 : vector<2x32xf32>
    %cst_24 = arith.constant 1.000000e+00 : f32
    %37 = vector.broadcast %cst_24 : f32 to vector<2x32xf32>
    %38 = arith.addf %37, %36 : vector<2x32xf32>
    %39 = arith.divf %37, %38 : vector<2x32xf32>
    %40 = vector.extract_strided_slice %26 {offsets = [0, 64], sizes = [2, 32], strides = [1, 1]} : vector<2x128xf32> to vector<2x32xf32>
    %41 = math.tanh %40 : vector<2x32xf32>
    %42 = vector.extract_strided_slice %26 {offsets = [0, 96], sizes = [2, 32], strides = [1, 1]} : vector<2x128xf32> to vector<2x32xf32>
    %43 = arith.negf %42 : vector<2x32xf32>
    %44 = math.exp %43 : vector<2x32xf32>
    %cst_25 = arith.constant 1.000000e+00 : f32
    %45 = vector.broadcast %cst_25 : f32 to vector<2x32xf32>
    %46 = arith.addf %45, %44 : vector<2x32xf32>
    %47 = arith.divf %45, %46 : vector<2x32xf32>
    %c0_26 = arith.constant 0 : index
    %c0_27 = arith.constant 0 : index
    %48 = vector.load %arg2[%c0_26, %c0_27] : memref<2x32xf32, #tpu.memory_space<vmem>>, vector<2x32xf32>
    %49 = arith.mulf %39, %48 : vector<2x32xf32>
    %50 = arith.mulf %33, %41 : vector<2x32xf32>
    %51 = arith.addf %49, %50 : vector<2x32xf32>
    %52 = math.tanh %51 : vector<2x32xf32>
    %53 = arith.mulf %47, %52 : vector<2x32xf32>
    %c0_28 = arith.constant 0 : index
    %c0_29 = arith.constant 0 : index
    %54 = vector.load %arg16[%c0_28, %c0_29] : memref<32x97xf32, #tpu.memory_space<vmem>>, vector<32x97xf32>
    %cst_30 = arith.constant dense<0.000000e+00> : vector<2x97xf32>
    %55 = tpu.matmul %53, %54, %cst_30 {dimension_numbers = #tpu.dot_dimension_numbers<[1], [0], [0], [1], [0, 0, 1, 1], [], []>} : vector<2x32xf32>, vector<32x97xf32>, vector<2x97xf32> -> vector<2x97xf32>
    %c0_31 = arith.constant 0 : index
    %c0_32 = arith.constant 0 : index
    %56 = vector.load %arg17[%c0_31, %c0_32] : memref<32x65xf32, #tpu.memory_space<vmem>>, vector<32x65xf32>
    %cst_33 = arith.constant dense<0.000000e+00> : vector<2x65xf32>
    %57 = tpu.matmul %51, %56, %cst_33 {dimension_numbers = #tpu.dot_dimension_numbers<[1], [0], [0], [1], [0, 0, 1, 1], [], []>} : vector<2x32xf32>, vector<32x65xf32>, vector<2x65xf32> -> vector<2x65xf32>
    %58 = vector.extract_strided_slice %55 {offsets = [0, 0], sizes = [2, 64], strides = [1, 1]} : vector<2x97xf32> to vector<2x64xf32>
    %59 = vector.extract_strided_slice %57 {offsets = [0, 0], sizes = [2, 64], strides = [1, 1]} : vector<2x65xf32> to vector<2x64xf32>
    %60 = arith.addf %58, %59 : vector<2x64xf32>
    %c0_34 = arith.constant 0 : index
    %c0_35 = arith.constant 0 : index
    %61 = vector.load %arg18[%c0_34, %c0_35] : memref<1x64xf32, #tpu.memory_space<vmem>>, vector<1x64xf32>
    %62 = vector.broadcast %61 : vector<1x64xf32> to vector<2x64xf32>
    %63 = arith.addf %60, %62 : vector<2x64xf32>
    %64 = vector.extract_strided_slice %55 {offsets = [0, 64], sizes = [2, 32], strides = [1, 1]} : vector<2x97xf32> to vector<2x32xf32>
    %65 = vector.extract_strided_slice %55 {offsets = [0, 96], sizes = [2, 1], strides = [1, 1]} : vector<2x97xf32> to vector<2x1xf32>
    %66 = vector.extract_strided_slice %57 {offsets = [0, 64], sizes = [2, 1], strides = [1, 1]} : vector<2x65xf32> to vector<2x1xf32>
    %c0_36 = arith.constant 0 : index
    %c0_37 = arith.constant 0 : index
    %67 = vector.load %arg19[%c0_36, %c0_37] : memref<1x64xf32, #tpu.memory_space<vmem>>, vector<1x64xf32>
    %68 = vector.shape_cast %67 : vector<1x64xf32> to vector<1x1x64xf32>
    %c0_38 = arith.constant 0 : index
    %c0_39 = arith.constant 0 : index
    %69 = vector.load %arg20[%c0_38, %c0_39] : memref<1x64xf32, #tpu.memory_space<vmem>>, vector<1x64xf32>
    %70 = vector.shape_cast %69 : vector<1x64xf32> to vector<1x1x64xf32>
    %c0_40 = arith.constant 0 : index
    %c0_41 = arith.constant 0 : index
    %71 = vector.load %arg8[%c0_40, %c0_41] : memref<2x8xf32, #tpu.memory_space<vmem>>, vector<2x8xf32>
    %c0_42 = arith.constant 0 : index
    %c0_43 = arith.constant 0 : index
    %c0_44 = arith.constant 0 : index
    %72 = vector.load %arg4[%c0_42, %c0_43, %c0_44] : memref<2x8x64xf32, #tpu.memory_space<vmem>>, vector<2x8x64xf32>
    %73 = vector.shape_cast %63 : vector<2x64xf32> to vector<2x1x64xf32>
    %74 = vector.broadcast %73 : vector<2x1x64xf32> to vector<2x8x64xf32>
    %75 = arith.addf %72, %74 : vector<2x8x64xf32>
    %76 = vector.shape_cast %71 : vector<2x8xf32> to vector<2x8x1xf32>
    %77 = vector.broadcast %76 : vector<2x8x1xf32> to vector<2x8x64xf32>
    %78 = vector.broadcast %68 : vector<1x1x64xf32> to vector<2x8x64xf32>
    %79 = arith.mulf %77, %78 : vector<2x8x64xf32>
    %80 = arith.addf %75, %79 : vector<2x8x64xf32>
    %81 = math.tanh %80 : vector<2x8x64xf32>
    %82 = vector.broadcast %70 : vector<1x1x64xf32> to vector<2x8x64xf32>
    %83 = arith.mulf %81, %82 : vector<2x8x64xf32>
    %cst_45 = arith.constant dense<0.000000e+00> : vector<2x8xf32>
    %84 = vector.multi_reduction <add>, %83, %cst_45 [2] : vector<2x8x64xf32> to vector<2x8xf32>
    %cst_46 = arith.constant dense<0xFF800000> : vector<2xf32>
    %85 = vector.multi_reduction <maximumf>, %84, %cst_46 [1] : vector<2x8xf32> to vector<2xf32>
    %86 = vector.shape_cast %85 : vector<2xf32> to vector<2x1xf32>
    %87 = vector.broadcast %86 : vector<2x1xf32> to vector<2x8xf32>
    %88 = arith.subf %84, %87 : vector<2x8xf32>
    %89 = math.exp %88 : vector<2x8xf32>
    %c0_47 = arith.constant 0 : index
    %c0_48 = arith.constant 0 : index
    %90 = vector.load %arg5[%c0_47, %c0_48] : memref<2x8xf32, #tpu.memory_space<vmem>>, vector<2x8xf32>
    %91 = arith.mulf %89, %90 : vector<2x8xf32>
    %cst_49 = arith.constant dense<0.000000e+00> : vector<2xf32>
    %92 = vector.multi_reduction <add>, %91, %cst_49 [1] : vector<2x8xf32> to vector<2xf32>
    %93 = vector.shape_cast %92 : vector<2xf32> to vector<2x1xf32>
    %94 = tpu.reciprocal %93 : vector<2x1xf32> -> vector<2x1xf32>
    %95 = vector.broadcast %94 : vector<2x1xf32> to vector<2x8xf32>
    %96 = arith.mulf %91, %95 : vector<2x8xf32>
    %97 = arith.addf %71, %96 : vector<2x8xf32>
    %98 = vector.shape_cast %96 : vector<2x8xf32> to vector<2x1x8xf32>
    %c0_50 = arith.constant 0 : index
    %c0_51 = arith.constant 0 : index
    %c0_52 = arith.constant 0 : index
    %99 = vector.load %arg3[%c0_50, %c0_51, %c0_52] : memref<2x8x64xf32, #tpu.memory_space<vmem>>, vector<2x8x64xf32>
    "tpu.trace_start"() <{level = 10 : i32, message = "bst,btk->bsk"}> : () -> ()
    %cst_53 = arith.constant dense<0.000000e+00> : vector<2x1x64xf32>
    %100 = tpu.matmul %98, %99, %cst_53 {dimension_numbers = #tpu.dot_dimension_numbers<[2], [1], [1], [2], [0, 0, 0, 1, 1, 2], [0], [0]>} : vector<2x1x8xf32>, vector<2x8x64xf32>, vector<2x1x64xf32> -> vector<2x1x64xf32>
    "tpu.trace_stop"() : () -> ()
    %101 = vector.shape_cast %100 : vector<2x1x64xf32> to vector<2x64xf32>
    %c0_54 = arith.constant 0 : index
    %c0_55 = arith.constant 0 : index
    %102 = vector.load %arg21[%c0_54, %c0_55] : memref<64x33xf32, #tpu.memory_space<vmem>>, vector<64x33xf32>
    %cst_56 = arith.constant dense<0.000000e+00> : vector<2x33xf32>
    %103 = tpu.matmul %101, %102, %cst_56 {dimension_numbers = #tpu.dot_dimension_numbers<[1], [0], [0], [1], [0, 0, 1, 1], [], []>} : vector<2x64xf32>, vector<64x33xf32>, vector<2x33xf32> -> vector<2x33xf32>
    %104 = vector.extract_strided_slice %103 {offsets = [0, 0], sizes = [2, 32], strides = [1, 1]} : vector<2x33xf32> to vector<2x32xf32>
    %105 = vector.extract_strided_slice %103 {offsets = [0, 32], sizes = [2, 1], strides = [1, 1]} : vector<2x33xf32> to vector<2x1xf32>
    %106 = arith.addf %27, %65 : vector<2x1xf32>
    %107 = arith.addf %106, %66 : vector<2x1xf32>
    %108 = arith.addf %107, %105 : vector<2x1xf32>
    %c0_57 = arith.constant 0 : index
    %c0_58 = arith.constant 0 : index
    %109 = vector.load %arg22[%c0_57, %c0_58] : memref<1x1xf32, #tpu.memory_space<vmem>>, vector<1x1xf32>
    %110 = vector.broadcast %109 : vector<1x1xf32> to vector<2x1xf32>
    %111 = arith.addf %108, %110 : vector<2x1xf32>
    %112 = arith.negf %111 : vector<2x1xf32>
    %113 = math.exp %112 : vector<2x1xf32>
    %cst_59 = arith.constant 1.000000e+00 : f32
    %114 = vector.broadcast %cst_59 : f32 to vector<2x1xf32>
    %115 = arith.addf %114, %113 : vector<2x1xf32>
    %116 = arith.divf %114, %115 : vector<2x1xf32>
    %117 = arith.addf %64, %104 : vector<2x32xf32>
    %c0_60 = arith.constant 0 : index
    %c0_61 = arith.constant 0 : index
    %118 = vector.load %arg23[%c0_60, %c0_61] : memref<1x32xf32, #tpu.memory_space<vmem>>, vector<1x32xf32>
    %119 = vector.broadcast %118 : vector<1x32xf32> to vector<2x32xf32>
    %120 = arith.addf %117, %119 : vector<2x32xf32>
    %c0_62 = arith.constant 0 : index
    %c0_63 = arith.constant 0 : index
    %121 = vector.load %arg24[%c0_62, %c0_63] : memref<32x136xf32, #tpu.memory_space<vmem>>, vector<32x136xf32>
    %cst_64 = arith.constant dense<0.000000e+00> : vector<2x136xf32>
    %122 = tpu.matmul %120, %121, %cst_64 {dimension_numbers = #tpu.dot_dimension_numbers<[1], [0], [0], [1], [0, 0, 1, 1], [], []>} : vector<2x32xf32>, vector<32x136xf32>, vector<2x136xf32> -> vector<2x136xf32>
    %c0_65 = arith.constant 0 : index
    %c0_66 = arith.constant 0 : index
    %123 = vector.load %arg25[%c0_65, %c0_66] : memref<1x136xf32, #tpu.memory_space<vmem>>, vector<1x136xf32>
    %124 = vector.broadcast %123 : vector<1x136xf32> to vector<2x136xf32>
    %125 = arith.addf %122, %124 : vector<2x136xf32>
    %cst_67 = arith.constant dense<0xFF800000> : vector<2xf32>
    %126 = vector.multi_reduction <maximumf>, %125, %cst_67 [1] : vector<2x136xf32> to vector<2xf32>
    %127 = vector.shape_cast %126 : vector<2xf32> to vector<2x1xf32>
    %128 = vector.broadcast %127 : vector<2x1xf32> to vector<2x136xf32>
    %129 = arith.subf %125, %128 : vector<2x136xf32>
    %130 = math.exp %129 : vector<2x136xf32>
    %cst_68 = arith.constant dense<0.000000e+00> : vector<2xf32>
    %131 = vector.multi_reduction <add>, %130, %cst_68 [1] : vector<2x136xf32> to vector<2xf32>
    %132 = vector.shape_cast %131 : vector<2xf32> to vector<2x1xf32>
    %133 = tpu.reciprocal %132 : vector<2x1xf32> -> vector<2x1xf32>
    %134 = vector.broadcast %133 : vector<2x1xf32> to vector<2x136xf32>
    %135 = arith.mulf %130, %134 : vector<2x136xf32>
    %136 = vector.broadcast %116 : vector<2x1xf32> to vector<2x136xf32>
    %137 = arith.mulf %136, %135 : vector<2x136xf32>
    %cst_69 = arith.constant 1.000000e+00 : f32
    %138 = vector.broadcast %cst_69 : f32 to vector<2x1xf32>
    %139 = arith.subf %138, %116 : vector<2x1xf32>
    %140 = vector.broadcast %139 : vector<2x1xf32> to vector<2x8xf32>
    %141 = arith.mulf %140, %96 : vector<2x8xf32>
    %c0_70 = arith.constant 0 : index
    %c0_71 = arith.constant 0 : index
    %142 = vector.load %arg7[%c0_70, %c0_71] : memref<2x8xi32, #tpu.memory_space<vmem>>, vector<2x8xi32>
    %143 = tpu.iota {dimensions = array<i32: 2>} : vector<2x8x136xi32>
    %144 = vector.shape_cast %142 : vector<2x8xi32> to vector<2x8x1xi32>
    %145 = vector.broadcast %144 : vector<2x8x1xi32> to vector<2x8x136xi32>
    %146 = arith.cmpi eq, %143, %145 : vector<2x8x136xi32>
    %147 = vector.shape_cast %141 : vector<2x8xf32> to vector<2x8x1xf32>
    %cst_72 = arith.constant 0.000000e+00 : f32
    %148 = vector.shape_cast %147 : vector<2x8x1xf32> to vector<2x8x1xf32>
    %149 = vector.broadcast %148 : vector<2x8x1xf32> to vector<2x8x136xf32>
    %150 = vector.broadcast %cst_72 : f32 to vector<2x8x136xf32>
    %151 = arith.select %146, %149, %150 : vector<2x8x136xi1>, vector<2x8x136xf32>
    %cst_73 = arith.constant dense<0.000000e+00> : vector<2x136xf32>
    %152 = vector.multi_reduction <add>, %151, %cst_73 [1] : vector<2x8x136xf32> to vector<2x136xf32>
    %153 = arith.addf %137, %152 : vector<2x136xf32>
    %c0_74 = arith.constant 0 : index
    %c0_75 = arith.constant 0 : index
    %154 = vector.load %arg26[%c0_74, %c0_75] : memref<2x136xf32, #tpu.memory_space<vmem>>, vector<2x136xf32>
    tpu.vector_store %arg26[%c0_74, %c0_75], %153 {strides = array<i32>} : memref<2x136xf32, #tpu.memory_space<vmem>>, vector<2x136xf32>,
    %c0_76 = arith.constant 0 : index
    %c0_77 = arith.constant 0 : index
    %155 = vector.load %arg27[%c0_76, %c0_77] : memref<2x256xf32, #tpu.memory_space<vmem>>, vector<2x32xf32>
    tpu.vector_store %arg27[%c0_76, %c0_77], %53 {strides = array<i32>} : memref<2x256xf32, #tpu.memory_space<vmem>>, vector<2x32xf32>,
    %c0_78 = arith.constant 0 : index
    %c32 = arith.constant 32 : index
    %156 = vector.load %arg27[%c0_78, %c32] : memref<2x256xf32, #tpu.memory_space<vmem>>, vector<2x32xf32>
    tpu.vector_store %arg27[%c0_78, %c32], %51 {strides = array<i32>} : memref<2x256xf32, #tpu.memory_space<vmem>>, vector<2x32xf32>,
    %c0_79 = arith.constant 0 : index
    %c64 = arith.constant 64 : index
    %157 = vector.load %arg27[%c0_79, %c64] : memref<2x256xf32, #tpu.memory_space<vmem>>, vector<2x64xf32>
    tpu.vector_store %arg27[%c0_79, %c64], %101 {strides = array<i32>} : memref<2x256xf32, #tpu.memory_space<vmem>>, vector<2x64xf32>,
    %c0_80 = arith.constant 0 : index
    %c128 = arith.constant 128 : index
    %158 = vector.load %arg27[%c0_80, %c128] : memref<2x256xf32, #tpu.memory_space<vmem>>, vector<2x1xf32>
    tpu.vector_store %arg27[%c0_80, %c128], %116 {strides = array<i32>} : memref<2x256xf32, #tpu.memory_space<vmem>>, vector<2x1xf32>,
    %c0_81 = arith.constant 0 : index
    %c129 = arith.constant 129 : index
    %159 = vector.load %arg27[%c0_81, %c129] : memref<2x256xf32, #tpu.memory_space<vmem>>, vector<2x8xf32>
    tpu.vector_store %arg27[%c0_81, %c129], %96 {strides = array<i32>} : memref<2x256xf32, #tpu.memory_space<vmem>>, vector<2x8xf32>,
    %c0_82 = arith.constant 0 : index
    %c137 = arith.constant 137 : index
    %160 = vector.load %arg27[%c0_82, %c137] : memref<2x256xf32, #tpu.memory_space<vmem>>, vector<2x8xf32>
    tpu.vector_store %arg27[%c0_82, %c137], %97 {strides = array<i32>} : memref<2x256xf32, #tpu.memory_space<vmem>>, vector<2x8xf32>,
    %cst_83 = arith.constant 0.000000e+00 : f32
    %161 = vector.broadcast %cst_83 : f32 to vector<2x111xf32>
    %c0_84 = arith.constant 0 : index
    %c145 = arith.constant 145 : index
    %162 = vector.load %arg27[%c0_84, %c145] : memref<2x256xf32, #tpu.memory_space<vmem>>, vector<2x111xf32>
    tpu.vector_store %arg27[%c0_84, %c145], %161 {strides = array<i32>} : memref<2x256xf32, #tpu.memory_space<vmem>>, vector<2x111xf32>,
    return
  }
}

</mosaic_0001>

<bundles_post_ra>
// kernel: tpu_custom_call.1
= control target key start
LH: loop header
LB: loop body
LE: loop exit
PB: predicated region body
PF: predicated region fallthrough
CT: control target
= control target key end

     0   :  { %s1665_s0 = inlined_call_operand.vmem [shape: s32[2,1], index: 0, kind: input, shape index: {}]   ;;  %s1666_s1 = inlined_call_operand.vmem [shape: f32[2,32], index: 1, kind: input, shape index: {}]   ;;  %s1667_s2 = inlined_call_operand.vmem [shape: f32[2,32], index: 2, kind: input, shape index: {}]   ;;  %s1668_s3 = inlined_call_operand.vmem [shape: f32[2,8,64], index: 3, kind: input, shape index: {}]   ;;  %s1669_s4 = inlined_call_operand.vmem [shape: f32[2,8,64], index: 4, kind: input, shape index: {}]   ;;  %s1670_s5 = inlined_call_operand.vmem [shape: f32[2,8], index: 5, kind: input, shape index: {}]   ;;  %s1671_s6 = inlined_call_operand.hbm [shape: f32[2,64], index: 6, kind: input, shape index: {}]   ;;  %s1672_s7 = inlined_call_operand.hbm [shape: s32[2,8], index: 7, kind: input, shape index: {}]   ;;  %s1673_s8 = inlined_call_operand.vmem [shape: f32[2,8], index: 8, kind: input, shape index: {}]   ;;  %s1674_s9 = inlined_call_operand.vmem [shape: f32[128,32], index: 9, kind: input, shape index: {}]   ;;  %s1675_s10 = inlined_call_operand.vmem [shape: f32[64,32], index: 10, kind: input, shape index: {}]   ;;  %s1676_s11 = inlined_call_operand.vmem [shape: f32[32,32], index: 11, kind: input, shape index: {}]   ;;  %s1677_s12 = inlined_call_operand.vmem [shape: f32[1,32], index: 12, kind: input, shape index: {}]   ;;  %s1678_s13 = inlined_call_operand.vmem [shape: f32[32,129], index: 13, kind: input, shape index: {}]   ;;  %s1679_s14 = inlined_call_operand.vmem [shape: f32[32,128], index: 14, kind: input, shape index: {}]   ;;  %s1680_s15 = inlined_call_operand.vmem [shape: f32[1,128], index: 15, kind: input, shape index: {}]   ;;  %s1681_s16 = inlined_call_operand.vmem [shape: f32[32,97], index: 16, kind: input, shape index: {}]   ;;  %s1682_s17 = inlined_call_operand.vmem [shape: f32[32,65], index: 17, kind: input, shape index: {}]   ;;  %s1683_s18 = inlined_call_operand.vmem [shape: f32[1,64], index: 18, kind: input, shape index: {}]   ;;  %s1684_s19 = inlined_call_operand.vmem [shape: f32[1,64], index: 19, kind: input, shape index: {}]   ;;  %s1685_s20 = inlined_call_operand.vmem [shape: f32[1,64], index: 20, kind: input, shape index: {}]   ;;  %s1686_s21 = inlined_call_operand.vmem [shape: f32[64,33], index: 21, kind: input, shape index: {}]   ;;  %s1687_s22 = inlined_call_operand.<no memory space> [shape: f32[1,1], index: 22, kind: input, shape index: {}]   ;;  %s1688_s23 = inlined_call_operand.vmem [shape: f32[1,32], index: 23, kind: input, shape index: {}]   ;;  %s1689_s24 = inlined_call_operand.vmem [shape: f32[32,136], index: 24, kind: input, shape index: {}]   ;;  %s1690_s25 = inlined_call_operand.vmem [shape: f32[1,136], index: 25, kind: input, shape index: {}]   ;;  %s1691_s26 = inlined_call_operand.hbm [shape: f32[2,136], index: 26, kind: output, shape index: {0}]   ;;  %s1692_s27 = inlined_call_operand.hbm [shape: f32[2,256], index: 27, kind: output, shape index: {1}]  }
   0x1   :  { %1698 = sst [smem:[#allocation15_spill]] %s1665_s0  ;;  %v33_v0 = vstv %s1687_s22 }
   0x2   :  { %1699 = sst [smem:[#allocation16_spill]] %s1666_s1  ;;  %34 = vst [vmem:[#allocation2] sm:$0x1] %v33_v0 }
   0x3   :  { %1700 = sst [smem:[#allocation17_spill]] %s1667_s2 }
   0x4   :  { %1701 = sst [smem:[#allocation18_spill]] %s1668_s3 }
   0x5   :  { %1702 = sst [smem:[#allocation19_spill]] %s1669_s4 }
   0x6   :  { %1703 = sst [smem:[#allocation20_spill]] %s1670_s5 }
   0x7   :  { %1704 = sst [smem:[#allocation21_spill]] %s1671_s6 }
   0x8   :  { %1705 = sst [smem:[#allocation22_spill]] %s1672_s7 }
   0x9   :  { %1706 = sst [smem:[#allocation23_spill]] %s1673_s8 }
   0xa   :  { %1707 = sst [smem:[#allocation24_spill]] %s1674_s9 }
   0xb   :  { %1708 = sst [smem:[#allocation25_spill]] %s1675_s10 }
   0xc   :  { %1709 = sst [smem:[#allocation26_spill]] %s1676_s11 }
   0xd   :  { %35 = vsyncpa [#allocation4], 0 }
   0xe   :  { %36 = vsyncpa [#allocation7], 0 }
   0xf   :  { %37 = vsyncpa [#allocation5], 0 }
  0x10   :  { %38 = vsyncpa [#allocation10], 0  ;;  %s1710_s9 = sld [smem:[#allocation21_spill]]  ;;  %s1152_s28 = smov [#allocation3]  }
  0x11   :  { %s58_s0 = sshll.u32 %s1152_s28, 4  ;;  %s1711_s1 = sld [smem:[#allocation22_spill]]  ;;  %s59_s0 = int_to_ptr.vmem [resolvable:$true] %s58_s0 }
  0x12   :  { %s1153_s22 = smov [#allocation6]  }
  0x13   :  { %s69_s11 = sshll.u32 %s1153_s22, 4  ;;  %s70_s11 = int_to_ptr.vmem [resolvable:$true] %s69_s11 }
  0x16   :  { %s56_s5 = sshll.u32 %s1710_s9, 4  ;;  %s57_s5 = int_to_ptr.hbm [resolvable:$true] %s56_s5 }
  0x17   :  { %s67_s6 = sshll.u32 %s1711_s1, 4  ;;  %s68_s6 = int_to_ptr.hbm [resolvable:$true] %s67_s6 }
  0x18   :  { %61 = dma.hbm_to_vmem [thread:$0]  %s57_s5, 32, %s59_s0, [#allocation4]  }
  0x19   :  { %72 = dma.hbm_to_vmem [thread:$0]  %s68_s6, 32, %s70_s11, [#allocation7]  }
  0x1a   :  { %1144 = dma.done.wait [#allocation4], 32  }
  0x1b   :  { %1145 = vsyncadd [#allocation4], 4294967264 }
  0x1c   :  { %1146 = dma.done.wait [#allocation7], 32  }
  0x1d   :  { %1147 = vsyncadd [#allocation7], 4294967264  ;;  %v1154_v1 = vmov 0   ;;  %s1712_s7 = sld [smem:[#allocation15_spill]]  ;;  %v162_v30 = vld [vmem:[#allocation3] sm:$0x3]  ;;  %v118_v31 = vlaneseq }
  0x1e   :  { %1004 = vset.pattern.permute.xlu0 %v1154_v1  ;;  %s1713_s30 = sld [smem:[#allocation24_spill]]  ;;  %vm199_vm0 = vcmask 523264   ;;  %v1155_v34 = vmov 1.0   ;;  %v234_v36 = vld [vmem:[%s1678_s13 + $0x30] sm:$0xff]  ;;  %v235_v37 = vld [vmem:[%s1678_s13 + $0x38] sm:$0xff]  ;;  %vm175_vm2 = vcmask 261120  }
  0x1f   :  { %s1714_s28 = sld [smem:[#allocation25_spill]]  ;;  %v1399_v32 = vand.u32 127, %v118_v31  ;;  %251 = vmatpush.msra.mxu3 %v234_v36  ;;  %v232_v39 = vld [vmem:[%s1678_s13 + $0x20] sm:$0xff]  ;;  %v233_v40 = vld [vmem:[%s1678_s13 + $0x28] sm:$0xff]  ;;  %v230_v41 = vld [vmem:[%s1678_s13 + $0x10] sm:$0xff]  ;;  %s1156_s29 = smov 32  }
  0x20   :  { %s1715_s11 = sld [smem:[#allocation26_spill]]  ;;  %v231_v42 = vld [vmem:[%s1678_s13 + $0x18] sm:$0xff]  ;;  %v228_v43 = vld [vmem:[%s1678_s13] sm:$0xff]  ;;  %v229_v44 = vld [vmem:[%s1678_s13 + $0x8] sm:$0xff]  ;;  %vm877_vm7 = vcmask 254976   ;;  %vm879_vm8 = vcmask 517376  }
  0x21   :  { %252 = vmatpush.msra.mxu3 %v232_v39  ;;  %v283_v45 = vld [vmem:[%s1679_s14 + $0x18] sm:$0xff]  ;;  %v282_v46 = vld [vmem:[%s1679_s14 + $0x10] sm:$0xff]  ;;  %v281_v47 = vld [vmem:[%s1679_s14 + $0x8] sm:$0xff]  ;;  %s1716_s10 = sld [smem:[#allocation17_spill]]  ;;  %vm470_vm9 = vcmask 1041409   ;;  %vm473_vm10 = vcmask 58368  }
  0x22   :  { %v280_v48 = vld [vmem:[%s1679_s14] sm:$0xff]  ;;  %s1718_s3 = sld [smem:[#allocation23_spill]]  ;;  %vm559_vm15 = vcmask 64512  }
  0x23   :  { %v117_v2 = vld [vmem:[%s1712_s7] sm:$0x3]  ;;  %253 = vmatpush.msra.mxu3 %v230_v41  ;;  %s1719_s5 = sld [smem:[#allocation19_spill]] }
  0x24   :  { %v141_v3 = vld [vmem:[%s1713_s30 + $0x78] sm:$0xff]  ;;  %v140_v4 = vld [vmem:[%s1713_s30 + $0x70] sm:$0xff]  ;;  %121 = vperm.xlu0 %1004, %v117_v2   ;;  %v139_v5 = vld [vmem:[%s1713_s30 + $0x68] sm:$0xff]  ;;  %s1720_s6 = sld [smem:[#allocation20_spill]] }
  0x25   :  { %142 = vmatpush.msra.mxu0 %v141_v3  ;;  %v138_v6 = vld [vmem:[%s1713_s30 + $0x60] sm:$0xff]  ;;  %v137_v7 = vld [vmem:[%s1713_s30 + $0x58] sm:$0xff]  ;;  %v136_v8 = vld [vmem:[%s1713_s30 + $0x50] sm:$0xff]  ;;  %254 = vmatpush.msra.mxu3 %v228_v43  ;;  %s1721_s22 = sld [smem:[#allocation18_spill]] }
  0x26   :  { %v135_v9 = vld [vmem:[%s1713_s30 + $0x48] sm:$0xff]  ;;  %v134_v10 = vld [vmem:[%s1713_s30 + $0x40] sm:$0xff]  ;;  %v133_v11 = vld [vmem:[%s1713_s30 + $0x38] sm:$0xff] }
  0x27   :  { %143 = vmatpush.msra.mxu0 %v140_v4  ;;  %v132_v12 = vld [vmem:[%s1713_s30 + $0x30] sm:$0xff]  ;;  %v131_v13 = vld [vmem:[%s1713_s30 + $0x28] sm:$0xff]  ;;  %v130_v14 = vld [vmem:[%s1713_s30 + $0x20] sm:$0xff]  ;;  %299 = vmatpush.msrb.mxu3 %v283_v45 }
  0x28   :  { %v129_v15 = vld [vmem:[%s1713_s30 + $0x18] sm:$0xff]  ;;  %v128_v16 = vld [vmem:[%s1713_s30 + $0x10] sm:$0xff]  ;;  %v127_v17 = vld [vmem:[%s1713_s30 + $0x8] sm:$0xff] }
  0x29   :  { %144 = vmatpush.msra.mxu0 %v139_v5  ;;  %v126_v18 = vld [vmem:[%s1713_s30] sm:$0xff]  ;;  %v170_v19 = vld [vmem:[%s1714_s28 + $0x38] sm:$0xff]  ;;  %v169_v20 = vld [vmem:[%s1714_s28 + $0x30] sm:$0xff]  ;;  %300 = vmatpush.msrb.mxu3 %v282_v46  ;;  %s1717_s30 = sld [smem:[#allocation16_spill]] }
  0x2a   :  { %211 = vmatpush.msra.mxu2 %v170_v19  ;;  %v168_v21 = vld [vmem:[%s1714_s28 + $0x28] sm:$0xff]  ;;  %v174_v22 = vld [vmem:[%s1715_s11 + $0x18] sm:$0xff]  ;;  %v173_v23 = vld [vmem:[%s1715_s11 + $0x10] sm:$0xff] }
  0x2b   :  { %145 = vmatpush.msra.mxu0 %v138_v6  ;;  %191 = vmatpush.msra.mxu1 %v174_v22  ;;  %v167_v24 = vld [vmem:[%s1714_s28 + $0x20] sm:$0xff]  ;;  %v172_v25 = vld [vmem:[%s1715_s11 + $0x8] sm:$0xff]  ;;  %v166_v26 = vld [vmem:[%s1714_s28 + $0x18] sm:$0xff] }
  0x2c   :  { %212 = vmatpush.msra.mxu2 %v169_v20  ;;  %v165_v27 = vld [vmem:[%s1714_s28 + $0x10] sm:$0xff]  ;;  %v164_v28 = vld [vmem:[%s1714_s28 + $0x8] sm:$0xff]  ;;  %v163_v29 = vld [vmem:[%s1714_s28] sm:$0xff]  ;;  %301 = vmatpush.msrb.mxu3 %v281_v47 }
  0x2d   :  { %146 = vmatpush.msra.mxu0 %v137_v7  ;;  %192 = vmatpush.msra.mxu1 %v173_v23  ;;  %v171_v35 = vld [vmem:[%s1715_s11] sm:$0xff]  ;;  %v387_v19 = vld [vmem:[%s1682_s17 + $0x18] sm:$0xff]  ;;  %v386_v20 = vld [vmem:[%s1682_s17 + $0x10] sm:$0xff] }
  0x2e   :  { %213 = vmatpush.msra.mxu2 %v168_v21  ;;  %302 = vmatpush.msrb.mxu3 %v280_v48  ;;  %v333_v49 = vld [vmem:[%s1716_s10] sm:$0x3]  ;;  %v385_v21 = vld [vmem:[%s1682_s17 + $0x8] sm:$0xff]  ;;  %v358_v23 = vld [vmem:[%s1681_s16 + $0x18] sm:$0xff]  ;;  %s950_s10 = sshll.u32 %s1691_s26, 4  ;;  %s951_s10 = int_to_ptr.hbm [resolvable:$true] %s950_s10 }
  0x2f   :  { %147 = vmatpush.msra.mxu0 %v136_v8  ;;  %193 = vmatpush.msra.mxu1 %v172_v25  ;;  %v1013_v51 = vld [vmem:[%s1677_s12] ss:$0 sm:$0xff]  ;;  %s1157_s12 = smov 64   ;;  %v356_v25 = vld [vmem:[%s1681_s16 + $0x8] sm:$0xff] }
  0x30   :  { %214 = vmatpush.msra.mxu2 %v167_v24  ;;  %335 = vrot.lane.b32.xlu1 %v333_v49, %s1156_s29  ;;  %v279_v55 = vld [vmem:[%s1717_s30] sm:$0x3]  ;;  %v357_v24 = vld [vmem:[%s1681_s16 + $0x10] sm:$0xff]  ;;  %v423_v49 = vld [vmem:[%s1719_s5 + $0x8] sm:$0xff] }
  0x31   :  { %148 = vmatpush.msra.mxu0 %v135_v9  ;;  %194 = vmatpush.msra.mxu1 %v171_v35  ;;  %v1014_v57 = vld [vmem:[%s1680_s15] ss:$0 sm:$0xff]  ;;  %s1158_s15 = smov 96  }
  0x32   :  { %215 = vmatpush.msra.mxu2 %v166_v26  ;;  %v384_v22 = vld [vmem:[%s1682_s17] sm:$0xff] }
  0x33   :  { %149 = vmatpush.msra.mxu0 %v134_v10  ;;  %271 = vmatpush.msrb.mxu1 %v235_v37  ;;  %v355_v26 = vld [vmem:[%s1681_s16] sm:$0xff] }
  0x34   :  { %216 = vmatpush.msra.mxu2 %v165_v27  ;;  %v1015_v37 = vld [vmem:[%s1683_s18] ss:$0 sm:$0xff]  ;;  %s961_s18 = sshll.u32 %s1692_s27, 4  ;;  %s1162_s27 = smov [#allocation8]   ;;  %s962_s18 = int_to_ptr.hbm [resolvable:$true] %s961_s18 }
  0x35   :  { %150 = vmatpush.msra.mxu0 %v133_v11  ;;  %272 = vmatpush.msrb.mxu1 %v233_v40  ;;  %v1016_v41 = vld [vmem:[%s1684_s19] ss:$0 sm:$0xff]  ;;  %s948_s13 = sshll.u32 %s1162_s27, 4  ;;  %s949_s13 = int_to_ptr.vmem [resolvable:$true] %s948_s13 }
  0x36   :  { %217 = vmatpush.msra.mxu2 %v164_v28 }
  0x37   :  { %151 = vmatpush.msra.mxu0 %v132_v12  ;;  %273 = vmatpush.msrb.mxu1 %v231_v42 }
  0x38   :  { %218 = vmatpush.msra.mxu2 %v163_v29 }
  0x39   :  { %152 = vmatpush.msra.mxu0 %v131_v13  ;;  %980 = vmatmul.msk.f32.vlgmr.msra.gmra.mxu2 %vm199_vm0, %v162_v30  ;;  %v1489_v30 = vshrl.u32 %v118_v31, 7 }
  0x3a   :  { %274 = vmatpush.msrb.mxu1 %v229_v44  ;;  %405 = vmatpush.msrb.mxu2 %v387_v19  ;;  %v422_v44 = vld [vmem:[%s1719_s5] sm:$0xff] }
  0x3b   :  { %153 = vmatpush.msra.mxu0 %v130_v14  ;;  %1005 = vset.pattern.permute.xlu1 %v1489_v30 }
  0x3c   :  { %406 = vmatpush.msrb.mxu2 %v386_v20  ;;  %1006 = vset.pattern.permute.xlu2 %v1489_v30 }
  0x3d   :  { %154 = vmatpush.msra.mxu0 %v129_v15  ;;  %1007 = vset.pattern.permute.xlu0 %v1489_v30 }
  0x3e   :  { %407 = vmatpush.msrb.mxu2 %v385_v21 }
  0x3f   :  { %155 = vmatpush.msra.mxu0 %v128_v16 }
  0x40   :  { %408 = vmatpush.msrb.mxu2 %v384_v22 }
  0x41   :  { %156 = vmatpush.msra.mxu0 %v127_v17 }
  0x43   :  { %157 = vmatpush.msra.mxu0 %v126_v18 }
  0x96   :  { %v122_v33 = vpop.permute.xlu0 %121 }
  0x97   :  { %vm123_vm1 = vcmp.eq.s32.totalorder %v1399_v32, %v122_v33  ;;  %v1496_v33 = vld [vmem:[%s1718_s3] sm:$0x3] }
  0x98   :  { %978 = vmatmul.msk.f32.vlgmr.msra.gmra.mxu0 %vm123_vm1, %v1155_v34  ;;  %v432_v34 = vperm.slane %v1496_v33, 0  ;;  %v439_v35 = vperm.slane %v1496_v33, 1  ;;  %vm886_vm1 = vcmask 1043459  }
  0xa2   :  { %v336_v14 = vpop.permute.xlu1 %335 }
  0xbc   :  { %v220_v50 = vpop.f32.mrf.mxu2 }
 0x115   :  { %v159_v38 = vpop.f32.mrf.mxu0 }
 0x116   :  { %979 = vmatmul.msk.f32.vlgmr.msra.gmra.mxu1 %vm175_vm2, %v159_v38 }
 0x117   :  { %376 = vmatpush.msra.mxu1 %v358_v23 }
 0x119   :  { %377 = vmatpush.msra.mxu1 %v357_v24 }
 0x11b   :  { %378 = vmatpush.msra.mxu1 %v356_v25 }
 0x11d   :  { %379 = vmatpush.msra.mxu1 %v355_v26 }
 0x193   :  { %v196_v52 = vpop.f32.mrf.mxu1 }
 0x194   :  { %v221_v53 = vadd.f32 %v220_v50, %v196_v52 }
 0x196   :  { %v227_v54 = vadd.f32 %v1013_v51, %v221_v53 }
 0x198   :  { %981 = vmatmul.msk.f32.vlgmr.msra.gmra.mxu3 %vm175_vm2, %v227_v54  ;;  %982 = vmatmul.msk.f32.vlgmr.msrb.gmra.mxu1 %vm175_vm2, %v227_v54 }
 0x1a0   :  { %983 = vmatmul.msk.f32.vlgmr.msrb.gmra.mxu3 %vm175_vm2, %v279_v55 }
 0x215   :  { %v1503_v36 = vpop.f32.mrf.mxu1 }
 0x21b   :  { %v256_v56 = vpop.f32.mrf.mxu3 }
 0x223   :  { %v304_v58 = vpop.f32.mrf.mxu3 }
 0x224   :  { %v307_v59 = vadd.f32 %v304_v58, %v256_v56  ;;  %v1017_v56 = vld [vmem:[%s1685_s20] ss:$0 sm:$0xff] }
 0x226   :  { %v312_v60 = vadd.f32 %v1014_v57, %v307_v59 }
 0x228   :  { %1020 = vtanh.f32 %v312_v60  ;;  %v984_v62 = vmul.f32 -1.442695, %v312_v60 }
 0x22a   :  { %1022 = vpow2.f32 %v984_v62 }
 0x22e   :  { %v1021_v61 = vpop.eup %1020 }
 0x22f   :  { %340 = vrot.lane.b32.xlu0 %v1021_v61, %s1157_s12 }
 0x230   :  { %v1023_v63 = vpop.eup %1022 }
 0x231   :  { %v316_v0 = vadd.f32 1.0, %v1023_v63  ;;  %v488_v63 = vld [vmem:[%s1720_s6] sm:$0x3] }
 0x233   :  { %1024 = vrcp.f32 %v316_v0  ;;  %v328_v7 = vand.u32 2147483648, %v316_v0  ;;  %vm322_vm4 = vweird.f32 %v316_v0  ;;  %v326_v8 = vand.u32 2147483647, %v316_v0 }
 0x235   :  { %v329_v10 = vor.u32 1.1754944e-38, %v328_v7  ;;  %vm327_vm6 = vcmp.eq.f32.partialorder %v326_v8, 8.507059e+37  ;;  %v490_v8 = vperm.slane %v488_v63, 0 }
 0x239   :  { %v1025_v2 = vpop.eup %1024 }
 0x23a   :  { %v318_v3 = vmul.f32 %v1025_v2, %v316_v0  ;;  %vm323_vm3 = vweird.f32 %v1025_v2  ;;  %v497_v0 = vperm.slane %v488_v63, 1 }
 0x23b   :  { %vm324_vm5 = vmor %vm322_vm4, %vm323_vm3  ;;  %vm888_vm3 = vcmask 1045509   ;;  %vm890_vm4 = vcmask 1047559  }
 0x23c   :  { %v319_v4 = vsub.f32 1.0, %v318_v3 }
 0x23e   :  { %v320_v5 = vmul.f32 %v1025_v2, %v319_v4 }
 0x240   :  { %v321_v6 = vadd.f32 %v1025_v2, %v320_v5 }
 0x242   :  { %v325_v9 = vsel %vm324_vm5, %v1025_v2, %v321_v6 }
 0x243   :  { %v330_v11 = vsel %vm327_vm6, %v329_v10, %v325_v9  ;;  %vm897_vm6 = vcmask 1024  }
 0x244   :  { %v338_v15 = vmul.f32 %v336_v14, %v330_v11 }
 0x2a1   :  { %v341_v12 = vpop.permute.xlu0 %340 }
 0x2a2   :  { %v343_v13 = vmul.f32 %v341_v12, %v330_v11 }
 0x2a4   :  { %345 = vrot.lane.b32.xlu1 %v343_v13, %s1156_s29 }
 0x2ac   :  { %437 = vperm.xlu1 %1005, %v432_v34  }
 0x2b4   :  { %1008 = vset.pattern.permute.xlu1 %v1154_v1 }
 0x316   :  { %v346_v16 = vpop.permute.xlu1 %345 }
 0x317   :  { %v348_v17 = vadd.f32 %v346_v16, %v338_v15 }
 0x319   :  { %1026 = vtanh.f32 %v348_v17 }
 0x31e   :  { %v438_v42 = vpop.permute.xlu1 %437 }
 0x31f   :  { %v1027_v18 = vpop.eup %1026  ;;  %v449_v47 = vmul.f32 %v1016_v41, %v438_v42  ;;  %v557_v42 = vld [vmem:[%s1721_s22] sm:$0xff] }
 0x320   :  { %351 = vrot.lane.b32.xlu2 %v1027_v18, %s1157_s12  ;;  %577 = vmatpush.msra.mxu3 %v557_v42 }
 0x328   :  { %389 = vrot.lane.b32.xlu2 %v348_v17, %s1158_s15 }
 0x330   :  { %444 = vperm.xlu2 %1006, %v439_v35  }
 0x37a   :  { %v352_v27 = vpop.permute.xlu2 %351 }
 0x37b   :  { %v354_v28 = vmul.f32 %v352_v27, %v330_v11 }
 0x37d   :  { %360 = vrot.lane.b32.xlu0 %v354_v28, %s1156_s29 }
 0x382   :  { %v390_v29 = vpop.permute.xlu2 %389 }
 0x383   :  { %986 = vmatmul.msk.f32.vlgmr.msrb.gmra.mxu2 %vm175_vm2, %v390_v29 }
 0x38a   :  { %v445_v45 = vpop.permute.xlu2 %444 }
 0x38b   :  { %v450_v52 = vmul.f32 %v1016_v41, %v445_v45 }
 0x3ef   :  { %v361_v31 = vpop.permute.xlu0 %360 }
 0x3f0   :  { %878 = vst.msk [vmem:[#allocation9] sm:$0x3] %vm877_vm7, %v361_v31  ;;  %985 = vmatmul.msk.f32.vlgmr.msra.gmra.mxu1 %vm175_vm2, %v361_v31 }
 0x3f1   :  { %880 = vst.msk [vmem:[#allocation9] sm:$0x3] %vm879_vm8, %v348_v17  ;;  %vm747_vm8 = vcmask 1041408  }
 0x406   :  { %v1508_v38 = vpop.f32.mrf.mxu2 }
 0x46d   :  { %v1510_v39 = vpop.f32.mrf.mxu1 }
 0x46e   :  { %v413_v40 = vadd.f32 %v1508_v38, %v1510_v39 }
 0x470   :  { %v418_v43 = vadd.f32 %v1015_v37, %v413_v40 }
 0x472   :  { %v426_v46 = vperm.slane %v418_v43, 0  ;;  %v425_v48 = vrot.slane %v418_v43, 1 }
 0x474   :  { %v430_v50 = vadd.f32 %v426_v46, %v422_v44  ;;  %v427_v51 = vperm.slane %v425_v48, 0 }
 0x476   :  { %v451_v53 = vadd.f32 %v449_v47, %v430_v50  ;;  %v431_v54 = vadd.f32 %v427_v51, %v423_v49 }
 0x478   :  { %1028 = vtanh.f32 %v451_v53  ;;  %v452_v55 = vadd.f32 %v450_v52, %v431_v54 }
 0x47a   :  { %1030 = vtanh.f32 %v452_v55 }
 0x47e   :  { %v1029_v57 = vpop.eup %1028 }
 0x47f   :  { %v458_v58 = vmul.f32 %v1029_v57, %v1017_v56  ;;  %v558_v57 = vld [vmem:[%s1721_s22 + $0x8] sm:$0xff] }
 0x480   :  { %v1031_v59 = vpop.eup %1030  ;;  %599 = vmatpush.msrb.mxu1 %v558_v57  ;;  %v696_v57 = vld [vmem:[%s1690_s25] sm:$0x3]  ;;  %s1159_s25 = smov 9  }
 0x481   :  { %v460_v60 = vsel %vm199_vm0, %v458_v58, 0.0  ;;  %v459_v61 = vmul.f32 %v1031_v59, %v1017_v56  ;;  %v1018_v56 = vld [vmem:[%s1688_s23] ss:$0 sm:$0xff]  ;;  %v611_v58 = vld [vmem:[%s1686_s21 + $0x38] sm:$0xff]  ;;  %v610_v59 = vld [vmem:[%s1686_s21 + $0x30] sm:$0xff] }
 0x482   :  { %461 = vadd.xlane.f32.xlu0 %v460_v60  ;;  %626 = vmatpush.msra.mxu2 %v611_v58  ;;  %v609_v60 = vld [vmem:[%s1686_s21 + $0x28] sm:$0xff]  ;;  %v699_v58 = vperm.slane %v696_v57, 1 }
 0x483   :  { %v463_v62 = vsel %vm199_vm0, %v459_v61, 0.0  ;;  %v608_v61 = vld [vmem:[%s1686_s21 + $0x20] sm:$0xff] }
 0x484   :  { %464 = vadd.xlane.f32.xlu1 %v463_v62  ;;  %627 = vmatpush.msra.mxu2 %v610_v59  ;;  %v607_v62 = vld [vmem:[%s1686_s21 + $0x18] sm:$0xff] }
 0x486   :  { %628 = vmatpush.msra.mxu2 %v609_v60  ;;  %v698_v60 = vperm.slane %v696_v57, 0 }
 0x488   :  { %629 = vmatpush.msra.mxu2 %v608_v61 }
 0x48a   :  { %630 = vmatpush.msra.mxu2 %v607_v62 }
 0x496   :  { %502 = vperm.xlu0 %1007, %v497_v0  }
 0x4f5   :  { %v462_v2 = vpop.xlane.xlu0 %461 }
 0x4f6   :  { %v468_v4 = vperm.slane %v462_v2, %v1399_v32 }
 0x4f7   :  { %v465_v3 = vpop.xlane.xlu1 %464 }
 0x4f8   :  { %v469_v5 = vperm.slane %v465_v3, %v1399_v32 }
 0x4fa   :  { %v471_v6 = vsel %vm470_vm9, %v469_v5, %v468_v4  ;;  %v606_v5 = vld [vmem:[%s1686_s21 + $0x10] sm:$0xff] }
 0x4fb   :  { %v474_v7 = vsel %vm473_vm10, %v471_v6, -inf  ;;  %631 = vmatpush.msra.mxu2 %v606_v5  ;;  %v605_v6 = vld [vmem:[%s1686_s21 + $0x8] sm:$0xff] }
 0x4fc   :  { %475 = vmax.xlane.f32.xlu2 %v474_v7  ;;  %v604_v7 = vld [vmem:[%s1686_s21] sm:$0xff] }
 0x4fd   :  { %632 = vmatpush.msra.mxu2 %v605_v6 }
 0x4ff   :  { %633 = vmatpush.msra.mxu2 %v604_v7 }
 0x508   :  { %v503_v16 = vpop.permute.xlu0 %502 }
 0x514   :  { %495 = vperm.xlu2 %1006, %v490_v8  }
 0x51c   :  { %1009 = vset.pattern.permute.xlu2 %v1154_v1 }
 0x56f   :  { %v476_v9 = vpop.xlane.xlu2 %475 }
 0x570   :  { %v478_v10 = vperm.slane %v476_v9, 0  ;;  %v479_v11 = vperm.slane %v476_v9, 1 }
 0x572   :  { %v482_v12 = vsub.f32 %v462_v2, %v478_v10  ;;  %v483_v13 = vsub.f32 %v465_v3, %v479_v11 }
 0x574   :  { %v484_v14 = vmul.f32 1.442695, %v482_v12  ;;  %v486_v15 = vmul.f32 1.442695, %v483_v13 }
 0x576   :  { %1032 = vpow2.f32 %v484_v14 }
 0x577   :  { %1034 = vpow2.f32 %v486_v15  ;;  %v496_v18 = vpop.permute.xlu2 %495 }
 0x57c   :  { %v1033_v17 = vpop.eup %1032 }
 0x57d   :  { %v1035_v19 = vpop.eup %1034  ;;  %v506_v20 = vmul.f32 %v1033_v17, %v496_v18  ;;  %v695_v17 = vld [vmem:[%s1689_s24 + $0x38] sm:$0xff]  ;;  %v692_v18 = vld [vmem:[%s1689_s24 + $0x20] sm:$0xff] }
 0x57e   :  { %v507_v21 = vmul.f32 %v1035_v19, %v503_v16  ;;  %v694_v16 = vld [vmem:[%s1689_s24 + $0x30] sm:$0xff]  ;;  %739 = vmatpush.msrb.mxu0 %v695_v17  ;;  %v693_v19 = vld [vmem:[%s1689_s24 + $0x28] sm:$0xff] }
 0x57f   :  { %511 = vperm.xlu1 %1008, %v506_v20   ;;  %719 = vmatpush.msrb.mxu3 %v694_v16 }
 0x580   :  { %514 = vperm.xlu2 %1009, %v507_v21   ;;  %740 = vmatpush.msrb.mxu0 %v693_v19 }
 0x581   :  { %720 = vmatpush.msrb.mxu3 %v692_v18 }
 0x5da   :  { %v515_v22 = vpop.permute.xlu2 %514 }
 0x5db   :  { %v517_v24 = vperm.slane %v515_v22, %v1399_v32  ;;  %v688_v22 = vld [vmem:[%s1689_s24] sm:$0xff] }
 0x5f1   :  { %v512_v23 = vpop.permute.xlu1 %511 }
 0x5f2   :  { %v516_v25 = vperm.slane %v512_v23, %v1399_v32  ;;  %v689_v23 = vld [vmem:[%s1689_s24 + $0x8] sm:$0xff] }
 0x5f4   :  { %v518_v26 = vsel %vm470_vm9, %v517_v24, %v516_v25 }
 0x5f5   :  { %v520_v27 = vsel %vm473_vm10, %v518_v26, 0.0 }
 0x5f6   :  { %521 = vadd.xlane.f32.xlu1 %v520_v27 }
 0x669   :  { %v522_v28 = vpop.xlane.xlu1 %521 }
 0x66a   :  { %1036 = vrcp.f32 %v522_v28  ;;  %v534_v31 = vand.u32 2147483648, %v522_v28  ;;  %v532_v40 = vand.u32 2147483647, %v522_v28  ;;  %vm528_vm12 = vweird.f32 %v522_v28 }
 0x66c   :  { %v535_v43 = vor.u32 1.1754944e-38, %v534_v31  ;;  %vm533_vm14 = vcmp.eq.f32.partialorder %v532_v40, 8.507059e+37  ;;  %v1019_v31 = vld [vmem:[#allocation2] ss:$0 sm:$0xff] }
 0x670   :  { %v1037_v29 = vpop.eup %1036 }
 0x671   :  { %v524_v34 = vmul.f32 %v1037_v29, %v522_v28  ;;  %vm529_vm11 = vweird.f32 %v1037_v29 }
 0x672   :  { %vm530_vm13 = vmor %vm528_vm12, %vm529_vm11 }
 0x673   :  { %v525_v35 = vsub.f32 1.0, %v524_v34 }
 0x675   :  { %v526_v37 = vmul.f32 %v1037_v29, %v525_v35 }
 0x677   :  { %v527_v41 = vadd.f32 %v1037_v29, %v526_v37 }
 0x679   :  { %v531_v44 = vsel %vm530_vm13, %v1037_v29, %v527_v41 }
 0x67a   :  { %v536_v45 = vsel %vm533_vm14, %v535_v43, %v531_v44 }
 0x67b   :  { %v538_v46 = vperm.slane %v536_v45, 0  ;;  %v539_v47 = vperm.slane %v536_v45, 1 }
 0x67d   :  { %v542_v48 = vmul.f32 %v538_v46, %v506_v20  ;;  %v543_v49 = vmul.f32 %v539_v47, %v507_v21  ;;  %v690_v20 = vld [vmem:[%s1689_s24 + $0x10] sm:$0xff]  ;;  %v691_v21 = vld [vmem:[%s1689_s24 + $0x18] sm:$0xff] }
 0x67e   :  { %721 = vmatpush.msrb.mxu3 %v690_v20  ;;  %741 = vmatpush.msrb.mxu0 %v691_v21  ;;  %v795_v20 = vadd.s32 128, %v1399_v32 }
 0x67f   :  { %547 = vperm.xlu2 %1009, %v542_v48   ;;  %v899_v50 = vrot.slane %v542_v48, 2  ;;  %v900_v51 = vrot.slane %v542_v48, 4  ;;  %v901_v52 = vrot.slane %v542_v48, 6  ;;  %905 = vst [vmem:[#allocation1] ss:$4 sm:$0xff] %v542_v48  ;;  %v902_v53 = vrot.slane %v543_v49, 2 }
 0x680   :  { %914 = vst [vmem:[#allocation1 + $0x20] ss:$4 sm:$0xff] %v543_v49  ;;  %v903_v54 = vrot.slane %v543_v49, 4  ;;  %v904_v55 = vrot.slane %v543_v49, 6  ;;  %722 = vmatpush.msrb.mxu3 %v688_v22  ;;  %742 = vmatpush.msrb.mxu0 %v689_v23 }
 0x681   :  { %907 = vst [vmem:[#allocation1 + $0x1] ss:$4 sm:$0xff] %v899_v50 }
 0x682   :  { %909 = vst [vmem:[#allocation1 + $0x2] ss:$4 sm:$0xff] %v900_v51 }
 0x683   :  { %911 = vst [vmem:[#allocation1 + $0x3] ss:$4 sm:$0xff] %v901_v52 }
 0x684   :  { %916 = vst [vmem:[#allocation1 + $0x21] ss:$4 sm:$0xff] %v902_v53 }
 0x685   :  { %918 = vst [vmem:[#allocation1 + $0x22] ss:$4 sm:$0xff] %v903_v54  ;;  %v794_v54 = vld [vmem:[#allocation6] sm:$0x3] }
 0x686   :  { %920 = vst [vmem:[#allocation1 + $0x23] ss:$4 sm:$0xff] %v904_v55  ;;  %v796_v55 = vperm.slane %v794_v54, 0 }
 0x687   :  { %550 = vperm.xlu2 %1009, %v543_v49  }
 0x68f   :  { %684 = vrot.lane.b32.xlu2 %v1018_v56, %s1157_s12  ;;  %v803_v56 = vperm.slane %v794_v54, 1 }
 0x697   :  { %639 = vrot.lane.b32.xlu2 %v1510_v39, %s1156_s29 }
 0x6d9   :  { %v548_v63 = vpop.permute.xlu2 %547 }
 0x6da   :  { %v552_v0 = vperm.slane %v548_v63, %v1399_v32 }
 0x6dc   :  { %987 = vmatmul.msk.f32.vlgmr.msra.gmra.mxu3 %vm559_vm15, %v552_v0 }
 0x6e1   :  { %v551_v2 = vpop.permute.xlu2 %550 }
 0x6e2   :  { %v553_v3 = vperm.slane %v551_v2, %v1399_v32 }
 0x6e4   :  { %988 = vmatmul.msk.f32.vlgmr.msrb.gmra.mxu1 %vm559_vm15, %v553_v3  ;;  %v1572_v4 = vsel %vm470_vm9, %v553_v3, %v552_v0 }
 0x6e9   :  { %v685_v26 = vpop.permute.xlu2 %684 }
 0x6f1   :  { %v640_v29 = vpop.permute.xlu2 %639 }
 0x6f2   :  { %v642_v34 = vadd.f32 %v640_v29, %v1503_v36 }
 0x75f   :  { %v579_v10 = vpop.f32.mrf.mxu3 }
 0x761   :  { %v601_v8 = vpop.f32.mrf.mxu1 }
 0x762   :  { %v614_v9 = vrot.slane %v601_v8, 7  ;;  %v556_v8 = vadd.f32 %v1572_v4, %v1496_v33 }
 0x764   :  { %v615_v11 = vsel %vm470_vm9, %v614_v9, %v579_v10  ;;  %v921_v10 = vld.sshfl [vmem:[#allocation1 + $0x20] sm:$0xff pattern:$0x73625140] }
 0x765   :  { %989 = vmatmul.msk.f32.vlgmr.msra.gmra.mxu2 %vm199_vm0, %v615_v11  ;;  %v887_v12 = vsel %vm886_vm1, %v614_v9, %v615_v11  ;;  %vm895_vm1 = vcmask 1041920  }
 0x766   :  { %v889_v13 = vsel %vm888_vm3, %v614_v9, %v887_v12  ;;  %vm941_vm3 = vcmask 1041544  }
 0x767   :  { %v1585_v14 = vsel %vm890_vm4, %v614_v9, %v889_v13  ;;  %v912_v9 = vld.sshfl [vmem:[#allocation1] sm:$0xff pattern:$0x73625140] }
 0x7e8   :  { %v635_v15 = vpop.f32.mrf.mxu2 }
 0x7e9   :  { %649 = vrot.lane.b32.xlu2 %v635_v15, %s1158_s15  ;;  %677 = vrot.lane.b32.xlu0 %v635_v15, %s1157_s12 }
 0x843   :  { %v650_v40 = vpop.permute.xlu2 %649 }
 0x85b   :  { %v678_v24 = vpop.permute.xlu0 %677 }
 0x85c   :  { %v680_v25 = vadd.f32 %v678_v24, %v1510_v39 }
 0x85e   :  { %v687_v27 = vadd.f32 %v685_v26, %v680_v25 }
 0x860   :  { %703 = vrot.lane.b32.xlu0 %v687_v27, %s1157_s12 }
 0x868   :  { %644 = vrot.lane.b32.xlu0 %v1508_v38, %s1157_s12 }
 0x8d2   :  { %v704_v28 = vpop.permute.xlu0 %703 }
 0x8d3   :  { %991 = vmatmul.msk.f32.vlgmr.msrb.gmra.mxu3 %vm175_vm2, %v704_v28  ;;  %992 = vmatmul.msk.f32.vlgmr.msrb.gmra.mxu0 %vm175_vm2, %v704_v28 }
 0x8da   :  { %v645_v35 = vpop.permute.xlu0 %644 }
 0x8db   :  { %v647_v37 = vadd.f32 %v645_v35, %v642_v34 }
 0x8dd   :  { %v652_v39 = vadd.f32 %v650_v40, %v647_v37 }
 0x8df   :  { %v657_v41 = vadd.f32 %v1019_v31, %v652_v39 }
 0x8e1   :  { %v990_v42 = vmul.f32 -1.442695, %v657_v41 }
 0x8e3   :  { %1038 = vpow2.f32 %v990_v42 }
 0x8e9   :  { %v1039_v43 = vpop.eup %1038 }
 0x8ea   :  { %v661_v44 = vadd.f32 1.0, %v1039_v43 }
 0x8ec   :  { %1040 = vrcp.f32 %v661_v44  ;;  %v673_v47 = vand.u32 2147483648, %v661_v44  ;;  %v671_v49 = vand.u32 2147483647, %v661_v44  ;;  %vm667_vm2 = vweird.f32 %v661_v44 }
 0x8ee   :  { %v674_v36 = vor.u32 1.1754944e-38, %v673_v47  ;;  %vm672_vm7 = vcmp.eq.f32.partialorder %v671_v49, 8.507059e+37 }
 0x8f2   :  { %v1041_v38 = vpop.eup %1040 }
 0x8f3   :  { %v663_v45 = vmul.f32 %v1041_v38, %v661_v44  ;;  %vm668_vm0 = vweird.f32 %v1041_v38 }
 0x8f4   :  { %vm669_vm5 = vmor %vm667_vm2, %vm668_vm0 }
 0x8f5   :  { %v664_v46 = vsub.f32 1.0, %v663_v45 }
 0x8f7   :  { %v665_v48 = vmul.f32 %v1041_v38, %v664_v46 }
 0x8f9   :  { %v666_v50 = vadd.f32 %v1041_v38, %v665_v48 }
 0x8fb   :  { %v670_v51 = vsel %vm669_vm5, %v1041_v38, %v666_v50  ;;  %vm873_vm5 = vcmask 60418  }
 0x8fc   :  { %v1620_v52 = vsel %vm672_vm7, %v674_v36, %v670_v51 }
 0x8fd   :  { %v787_v53 = vsub.f32 1.0, %v1620_v52  ;;  %898 = vst.msk [vmem:[#allocation9 + $0x2] sm:$0x3] %vm897_vm6, %v1620_v52  ;;  %vm874_vm6 = vmor %vm873_vm5, %vm747_vm8 }
 0x8ff   :  { %790 = vperm.xlu1 %1008, %v787_v53  }
 0x907   :  { %1010 = vset.pattern.permute.xlu1 %v1489_v30 }
 0x90f   :  { %801 = vperm.xlu1 %1010, %v796_v55  }
 0x917   :  { %808 = vperm.xlu1 %1010, %v803_v56  }
 0x950   :  { %v744_v59 = vpop.f32.mrf.mxu0 }
 0x951   :  { %v745_v61 = vadd.f32 %v744_v59, %v699_v58  ;;  %v928_v58 = vadd.s32 4294967295, %v1399_v32 }
 0x953   :  { %v749_v30 = vsel %vm473_vm10, %v745_v61, -inf }
 0x956   :  { %v724_v62 = vpop.f32.mrf.mxu3 }
 0x957   :  { %v725_v63 = vadd.f32 %v724_v62, %v698_v60 }
 0x959   :  { %v748_v0 = vsel %vm747_vm8, %v725_v63, -inf }
 0x95a   :  { %v750_v2 = vmax.f32 %v748_v0, %v749_v30 }
 0x95c   :  { %751 = vmax.xlane.f32.xlu0 %v750_v2 }
 0x971   :  { %v791_v3 = vpop.permute.xlu1 %790 }
 0x972   :  { %v793_v5 = vmul.f32 %v791_v3, %v1572_v4 }
 0x974   :  { %v814_v6 = vperm.slane %v793_v5, 0  ;;  %v821_v7 = vperm.slane %v793_v5, 1 }
 0x976   :  { %826 = vperm.xlu1 %1010, %v821_v7   ;;  %819 = vperm.xlu0 %1007, %v814_v6  }
 0x97e   :  { %1011 = vset.pattern.permute.xlu1 %v1154_v1  ;;  %936 = vrot.lane.b32.xlu0 %v556_v8, %s1159_s25 }
 0x97f   :  { %923 = vperm.xlu1 %1011, %v912_v9   ;;  %1012 = vset.pattern.permute.xlu0 %v1154_v1 }
 0x981   :  { %v802_v33 = vpop.permute.xlu1 %801 }
 0x982   :  { %vm810_vm11 = vcmp.eq.s32.totalorder %v1399_v32, %v802_v33  ;;  %vm811_vm12 = vcmp.eq.s32.totalorder %v795_v20, %v802_v33 }
 0x987   :  { %926 = vperm.xlu1 %1011, %v921_v10  }
 0x98f   :  { %892 = vrot.lane.b32.xlu1 %v1585_v14, %s1157_s12  ;;  %v809_v14 = vpop.permute.xlu1 %808  ;;  %s1160_s12 = smov [#allocation9]  }
 0x990   :  { %vm812_vm13 = vcmp.eq.s32.totalorder %v1399_v32, %v809_v14  ;;  %vm813_vm14 = vcmp.eq.s32.totalorder %v795_v20, %v809_v14  ;;  %s959_s9 = sshll.u32 %s1160_s12, 4  ;;  %v1161_v32 = vmov 0.0   ;;  %s960_s9 = int_to_ptr.vmem [resolvable:$true] %s959_s9 }
 0x9cf   :  { %v752_v11 = vpop.xlane.xlu0 %751 }
 0x9d0   :  { %v753_v12 = vsub.f32 %v725_v63, %v752_v11  ;;  %v754_v13 = vsub.f32 %v745_v61, %v752_v11 }
 0x9d2   :  { %v755_v15 = vmul.f32 1.442695, %v753_v12  ;;  %v757_v16 = vmul.f32 1.442695, %v754_v13 }
 0x9d4   :  { %1042 = vpow2.f32 %v755_v15 }
 0x9d5   :  { %1044 = vpow2.f32 %v757_v16 }
 0x9da   :  { %v1637_v4 = vpop.eup %1042 }
 0x9db   :  { %v1639_v17 = vpop.eup %1044  ;;  %v759_v1 = vsel %vm747_vm8, %v1637_v4, 0.0 }
 0x9dc   :  { %v760_v18 = vsel %vm473_vm10, %v1639_v17, 0.0  ;;  %vm933_vm10 = vcmask 66568  }
 0x9dd   :  { %v761_v19 = vadd.f32 %v760_v18, %v759_v1 }
 0x9df   :  { %762 = vadd.xlane.f32.xlu2 %v761_v19 }
 0x9e8   :  { %v820_v21 = vpop.permute.xlu0 %819  ;;  %v827_v22 = vpop.permute.xlu1 %826 }
 0x9e9   :  { %v828_v23 = vsel %vm810_vm11, %v820_v21, 0.0  ;;  %v829_v24 = vsel %vm811_vm12, %v820_v21, 0.0  ;;  %v830_v25 = vsel %vm812_vm13, %v827_v22, 0.0  ;;  %v831_v26 = vsel %vm813_vm14, %v827_v22, 0.0 }
 0x9ea   :  { %v832_v27 = vrot.slane %v828_v23, 4  ;;  %v838_v28 = vsel %vm559_vm15, %v829_v24, 0.0  ;;  %v845_v29 = vrot.slane %v830_v25, 4  ;;  %v851_v34 = vsel %vm559_vm15, %v831_v26, 0.0 }
 0x9eb   :  { %v839_v35 = vrot.slane %v838_v28, 4  ;;  %v852_v31 = vrot.slane %v851_v34, 4  ;;  %vm939_vm15 = vcmask 132168  }
 0x9ec   :  { %v833_v37 = vadd.f32 %v832_v27, %v828_v23  ;;  %v846_v40 = vadd.f32 %v845_v29, %v830_v25 }
 0x9ed   :  { %v840_v39 = vadd.f32 %v839_v35, %v838_v28  ;;  %v853_v41 = vadd.f32 %v852_v31, %v851_v34 }
 0x9ee   :  { %v834_v42 = vrot.slane %v833_v37, 2  ;;  %v847_v43 = vrot.slane %v846_v40, 2 }
 0x9ef   :  { %v841_v44 = vrot.slane %v840_v39, 2  ;;  %v854_v38 = vrot.slane %v853_v41, 2 }
 0x9f0   :  { %v835_v45 = vadd.f32 %v834_v42, %v833_v37  ;;  %v848_v46 = vadd.f32 %v847_v43, %v846_v40  ;;  %v937_v30 = vpop.permute.xlu0 %936 }
 0x9f1   :  { %v842_v47 = vadd.f32 %v841_v44, %v840_v39  ;;  %v855_v48 = vadd.f32 %v854_v38, %v853_v41  ;;  %v924_v49 = vpop.permute.xlu1 %923 }
 0x9f2   :  { %v836_v50 = vrot.slane %v835_v45, 1  ;;  %v849_v36 = vrot.slane %v848_v46, 1  ;;  %v929_v62 = vperm.slane %v924_v49, %v928_v58 }
 0x9f3   :  { %v843_v51 = vrot.slane %v842_v47, 1  ;;  %v856_v53 = vrot.slane %v855_v48, 1 }
 0x9f4   :  { %v837_v54 = vadd.f32 %v836_v50, %v835_v45  ;;  %v850_v55 = vadd.f32 %v849_v36, %v848_v46 }
 0x9f5   :  { %v844_v56 = vadd.f32 %v843_v51, %v842_v47  ;;  %v857_v57 = vadd.f32 %v856_v53, %v855_v48 }
 0x9f6   :  { %v862_v59 = vsel %vm470_vm9, %v850_v55, %v837_v54 }
 0x9f7   :  { %782 = vperm.xlu2 %1009, %v1620_v52   ;;  %v863_v60 = vsel %vm470_vm9, %v857_v57, %v844_v56 }
 0x9f9   :  { %v927_v61 = vpop.permute.xlu1 %926 }
 0x9fa   :  { %v930_v63 = vperm.slane %v927_v61, %v928_v58 }
 0x9fc   :  { %v931_v0 = vsel %vm470_vm9, %v930_v63, %v929_v62 }
 0x9fd   :  { %934 = vst.msk [vmem:[#allocation9 + $0x2] sm:$0x3] %vm933_vm10, %v931_v0 }
 0x9fe   :  { %940 = vst.msk [vmem:[#allocation9 + $0x2] sm:$0x3] %vm939_vm15, %v937_v30 }
 0x9ff   :  { %942 = vst.msk [vmem:[#allocation9 + $0x2] sm:$0x3] %vm941_vm3, %v1161_v32 }
 0xa01   :  { %v893_v2 = vpop.permute.xlu1 %892 }
 0xa02   :  { %896 = vst.msk [vmem:[#allocation9] sm:$0x3] %vm895_vm1, %v893_v2 }
 0xa03   :  { %964 = dma.vmem_to_hbm [thread:$0]  %s960_s9, 64, %s962_s18, [#allocation10]  }
 0xa52   :  { %v763_v52 = vpop.xlane.xlu2 %762 }
 0xa53   :  { %1046 = vrcp.f32 %v763_v52  ;;  %v775_v7 = vand.u32 2147483648, %v763_v52  ;;  %v773_v9 = vand.u32 2147483647, %v763_v52  ;;  %vm769_vm4 = vweird.f32 %v763_v52 }
 0xa55   :  { %v776_v11 = vor.u32 1.1754944e-38, %v775_v7  ;;  %vm774_vm2 = vcmp.eq.f32.partialorder %v773_v9, 8.507059e+37 }
 0xa59   :  { %v1047_v3 = vpop.eup %1046 }
 0xa5a   :  { %v765_v5 = vmul.f32 %v1047_v3, %v763_v52  ;;  %vm770_vm9 = vweird.f32 %v1047_v3  ;;  %v783_v33 = vpop.permute.xlu2 %782 }
 0xa5b   :  { %vm771_vm0 = vmor %vm769_vm4, %vm770_vm9 }
 0xa5c   :  { %v766_v6 = vsub.f32 1.0, %v765_v5 }
 0xa5e   :  { %v767_v8 = vmul.f32 %v1047_v3, %v766_v6 }
 0xa60   :  { %v768_v10 = vadd.f32 %v1047_v3, %v767_v8 }
 0xa62   :  { %v772_v12 = vsel %vm771_vm0, %v1047_v3, %v768_v10 }
 0xa63   :  { %v777_v13 = vsel %vm774_vm2, %v776_v11, %v772_v12 }
 0xa64   :  { %v778_v15 = vmul.f32 %v1637_v4, %v777_v13  ;;  %v779_v16 = vmul.f32 %v1639_v17, %v777_v13 }
 0xa66   :  { %v785_v1 = vmul.f32 %v783_v33, %v778_v15  ;;  %v786_v18 = vmul.f32 %v783_v33, %v779_v16 }
 0xa68   :  { %v867_v19 = vadd.f32 %v863_v60, %v786_v18  ;;  %v866_v14 = vadd.f32 %v862_v59, %v785_v1 }
 0xa6a   :  { %v870_v20 = vrot.slane %v867_v19, 6 }
 0xa6c   :  { %v871_v4 = vsel %vm747_vm8, %v866_v14, %v870_v20 }
 0xa6d   :  { %875 = vst.msk [vmem:[#allocation8] sm:$0xf] %vm874_vm6, %v871_v4 }
 0xa6e   :  { %953 = dma.vmem_to_hbm [thread:$0]  %s949_s13, 64, %s951_s10, [#allocation5]  }
 0xa6f   :  { %1148 = dma.done.wait [#allocation5], 64  }
 0xa70   :  { %1149 = vsyncadd [#allocation5], 4294967232 }
 0xa71   :  { %1150 = dma.done.wait [#allocation10], 64  }
 0xa72   :  { %1151 = vsyncadd [#allocation10], 4294967232 }
 0xa73   :  { %973 = vsyncpa [#allocation4], 1 }
 0xa74   :  { %974 = vsyncpa [#allocation7], 1 }
 0xa75   :  { %975 = vsyncpa [#allocation5], 1 }
 0xa76   :  { %976 = vsyncpa [#allocation10], 1 }

</bundles_post_ra>
